<compile_context>
chip_gen: v7x
topology: tpu7x:2x2x1
jax: 0.10.0
libtpu: 0.0.40
codegen_flags: <defaults>
</compile_context>

<pallas_src>
import functools
import math

import jax
import jax.numpy as jnp
from jax.experimental import pallas as pl
from jax.experimental.pallas import tpu as pltpu

# ---------------- small synthetic DistilBERT-like config ----------------
VOCAB = 100
HIDDEN = 32
N_HEADS = 4
HEAD_DIM = HIDDEN // N_HEADS
N_LAYERS = 2
FFN = 4 * HIDDEN
MAX_POS = 64
NUM_CLASSES = 2
LN_EPS = 1e-12
BN_EPS = 1e-5
NEG_BIG = -1e30          # scores stay f32 (preferred_element_type), so this is safe
LANE = 128

# ---- packed vector-slab row layout ----
ROW_EMB_G, ROW_EMB_B, ROW_BN_SCALE, ROW_BN_SHIFT, ROW_CLS_B = 0, 1, 2, 3, 4
ROW_LAYER0 = 5
R_QKV_B, R_O_B, R_LN1_G, R_LN1_B, R_F1_B, R_F2_B, R_LN2_G, R_LN2_B = range(8)
ROWS_PER_LAYER = 8
N_VEC_ROWS = ROW_LAYER0 + N_LAYERS * ROWS_PER_LAYER


def _gelu_tanh(x):
    # TODO(synk): DistilBERT uses exact-erf GELU; tanh approximation used here (rel err
    # ~1e-3) to avoid relying on an erf lowering in Mosaic; swap if bit-parity is needed.
    c = 0.7978845608028654  # sqrt(2/pi)
    return 0.5 * x * (1.0 + jnp.tanh(c * (x + 0.044715 * (x * x * x))))


# ---------------- the single fused forward kernel (one batch element per grid step) ----
def _fused_forward_kernel(ids_ref,                       # SMEM, scalar-prefetched ids
                          wemb_ref, pemb_ref, mask_ref,
                          qkvw_ref, ow_ref, f1w_ref, f2w_ref,
                          cw_ref, vec_ref,
                          o_ref, x_scr, *, seq):
    b = pl.program_id(0)

    def vrow(r, width=HIDDEN):
        return vec_ref[r:r + 1, :width]                   # (1, width) f32

    def ln(x, g_row, b_row):
        mu = jnp.mean(x, axis=-1, keepdims=True)
        var = jnp.mean(jnp.square(x - mu), axis=-1, keepdims=True)
        return (x - mu) * jax.lax.rsqrt(var + LN_EPS) * vrow(g_row) + vrow(b_row)

    # ---- fused embedding gather: token rows from the VMEM-resident table ----
    for i in range(seq):
        tok = ids_ref[b * seq + i]
        x_scr[i:i + 1, :] = wemb_ref[pl.ds(tok, 1), :]
    h = ln(x_scr[...] + pemb_ref[...], ROW_EMB_G, ROW_EMB_B)          # (S, H) f32

    bias = mask_ref[...]                                              # (1, 1, S) additive

    for l in range(N_LAYERS):
        base = ROW_LAYER0 + l * ROWS_PER_LAYER

        # fused QKV projection (1/sqrt(dh) folded into Q); bf16 MXU in, f32 accumulate
        qkv = jnp.dot(h.astype(jnp.bfloat16), qkvw_ref[l],
                      preferred_element_type=jnp.float32) \
            + vrow(base + R_QKV_B, 3 * HIDDEN)                        # (S, 3H)
        q = qkv[:, 0 * HIDDEN:1 * HIDDEN].reshape(seq, N_HEADS, HEAD_DIM)
        k = qkv[:, 1 * HIDDEN:2 * HIDDEN].reshape(seq, N_HEADS, HEAD_DIM)
        v = qkv[:, 2 * HIDDEN:3 * HIDDEN].reshape(seq, N_HEADS, HEAD_DIM)

        # all heads in one batched einsum; softmax in f32 with EUP reciprocal
        s = jnp.einsum("qhd,khd->hqk", q, k,
                       preferred_element_type=jnp.float32) + bias     # (NH, S, S)
        m = jnp.max(s, axis=-1, keepdims=True)
        e = jnp.exp(s - m)
        p = e * pl.reciprocal(jnp.sum(e, axis=-1, keepdims=True), approx=True)
        ctx = jnp.einsum("hqk,khd->qhd", p, v,
                         preferred_element_type=jnp.float32).reshape(seq, HIDDEN)

        # single output projection for all heads
        attn = jnp.dot(ctx.astype(jnp.bfloat16), ow_ref[l],
                       preferred_element_type=jnp.float32) + vrow(base + R_O_B)
        sa = ln(attn + h, base + R_LN1_G, base + R_LN1_B)             # post-LN (DistilBERT)

        ff = jnp.dot(sa.astype(jnp.bfloat16), f1w_ref[l],
                     preferred_element_type=jnp.float32) + vrow(base + R_F1_B, FFN)
        ff = _gelu_tanh(ff)
        ff = jnp.dot(ff.astype(jnp.bfloat16), f2w_ref[l],
                     preferred_element_type=jnp.float32) + vrow(base + R_F2_B)
        h = ln(ff + sa, base + R_LN2_G, base + R_LN2_B)

    # ---- classifier epilogue: CLS token + folded BatchNorm(eval) + Linear ----
    # TODO(synk): Dropout is identity (eval mode); training-mode RNG dropout not implemented.
    cls = h[0:1, :]                                                   # (1, H) CLS token
    norm = cls * vrow(ROW_BN_SCALE) + vrow(ROW_BN_SHIFT)
    logits = jnp.dot(norm.astype(jnp.bfloat16), cw_ref[...],
                     preferred_element_type=jnp.float32) + vrow(ROW_CLS_B, LANE)
    o_ref[...] = logits[None].astype(o_ref.dtype)                     # lane-dense (1,1,128)


# ---------------- parameters (deterministic synthetic init) ----------------
def init_params(key):
    ks = iter(jax.random.split(key, 8 + 16 * N_LAYERS))

    def nrm(shape):
        return jax.random.normal(next(ks), shape, jnp.float32) * 0.02

    params = {
        "word_emb": nrm((VOCAB, HIDDEN)),
        "pos_emb": nrm((MAX_POS, HIDDEN)),
        "emb_ln_g": jnp.ones((HIDDEN,), jnp.float32),
        "emb_ln_b": jnp.zeros((HIDDEN,), jnp.float32),
        "layers": [],
        "bn": {"mean": jnp.zeros((HIDDEN,), jnp.float32),
               "var": jnp.ones((HIDDEN,), jnp.float32),
               "gamma": jnp.ones((HIDDEN,), jnp.float32),
               "beta": jnp.zeros((HIDDEN,), jnp.float32)},
        "cls_w": nrm((HIDDEN, NUM_CLASSES)),
        "cls_b": jnp.zeros((NUM_CLASSES,), jnp.float32),
    }
    for _ in range(N_LAYERS):
        params["layers"].append({
            "q_w": nrm((HIDDEN, HIDDEN)), "q_b": jnp.zeros((HIDDEN,), jnp.float32),
            "k_w": nrm((HIDDEN, HIDDEN)), "k_b": jnp.zeros((HIDDEN,), jnp.float32),
            "v_w": nrm((HIDDEN, HIDDEN)), "v_b": jnp.zeros((HIDDEN,), jnp.float32),
            "o_w": nrm((HIDDEN, HIDDEN)), "o_b": jnp.zeros((HIDDEN,), jnp.float32),
            "ln1_g": jnp.ones((HIDDEN,), jnp.float32), "ln1_b": jnp.zeros((HIDDEN,), jnp.float32),
            "ff1_w": nrm((HIDDEN, FFN)), "ff1_b": jnp.zeros((FFN,), jnp.float32),
            "ff2_w": nrm((FFN, HIDDEN)), "ff2_b": jnp.zeros((HIDDEN,), jnp.float32),
            "ln2_g": jnp.ones((HIDDEN,), jnp.float32), "ln2_b": jnp.zeros((HIDDEN,), jnp.float32),
        })
    return params


# ---------------- forward: everything inside one pallas_call ----------------
def transformer_text_classifier(params, input_ids, attention_mask):
    B, S = input_ids.shape
    scale = 1.0 / math.sqrt(HEAD_DIM)
    L = params["layers"]

    # ---- stacked bf16 projection weights (MXU path) ----
    def stack_w(f):
        return jnp.stack([f(l) for l in L]).astype(jnp.bfloat16)

    qkv_w = stack_w(lambda l: jnp.concatenate([l["q_w"] * scale, l["k_w"], l["v_w"]], axis=1))
    o_w = stack_w(lambda l: l["o_w"])
    f1_w = stack_w(lambda l: l["ff1_w"])
    f2_w = stack_w(lambda l: l["ff2_w"])
    cls_w = (jnp.zeros((HIDDEN, LANE), jnp.float32)
             .at[:, :NUM_CLASSES].set(params["cls_w"])).astype(jnp.bfloat16)

    # ---- BatchNorm1d (eval) folded into an affine ----
    bn = params["bn"]
    bn_scale = bn["gamma"] * jax.lax.rsqrt(bn["var"] + BN_EPS)
    bn_shift = bn["beta"] - bn["mean"] * bn_scale

    # ---- single lane-dense f32 slab with every small vector ----
    def row(v):
        v = jnp.asarray(v, jnp.float32).reshape(-1)
        return jnp.pad(v, (0, LANE - v.shape[0]))

    rows = [row(params["emb_ln_g"]), row(params["emb_ln_b"]),
            row(bn_scale), row(bn_shift), row(params["cls_b"])]
    for l in L:
        rows += [row(jnp.concatenate([l["q_b"] * scale, l["k_b"], l["v_b"]])),
                 row(l["o_b"]), row(l["ln1_g"]), row(l["ln1_b"]),
                 row(l["ff1_b"]), row(l["ff2_b"]), row(l["ln2_g"]), row(l["ln2_b"])]
    vec_slab = jnp.stack(rows)                                        # (N_VEC_ROWS, 128)

    # additive attention-mask bias: 0 keep, NEG_BIG pad (shared across heads)
    mask_bias = (1.0 - attention_mask.astype(jnp.float32))[:, None, :] * NEG_BIG  # (B,1,S)
    ids_flat = input_ids.reshape(-1).astype(jnp.int32)
    pos_emb = params["pos_emb"][:S]

    kernel = functools.partial(_fused_forward_kernel, seq=S)
    grid_spec = pltpu.PrefetchScalarGridSpec(
        num_scalar_prefetch=1,
        grid=(B,),
        in_specs=[
            pl.BlockSpec((VOCAB, HIDDEN), lambda b, ids: (0, 0)),                 # word_emb
            pl.BlockSpec((S, HIDDEN), lambda b, ids: (0, 0)),                     # pos_emb
            pl.BlockSpec((1, 1, S), lambda b, ids: (b, 0, 0)),                    # mask bias
            pl.BlockSpec((N_LAYERS, HIDDEN, 3 * HIDDEN), lambda b, ids: (0, 0, 0)),  # qkv_w
            pl.BlockSpec((N_LAYERS, HIDDEN, HIDDEN), lambda b, ids: (0, 0, 0)),      # o_w
            pl.BlockSpec((N_LAYERS, HIDDEN, FFN), lambda b, ids: (0, 0, 0)),         # ff1_w
            pl.BlockSpec((N_LAYERS, FFN, HIDDEN), lambda b, ids: (0, 0, 0)),         # ff2_w
            pl.BlockSpec((HIDDEN, LANE), lambda b, ids: (0, 0)),                     # cls_w
            pl.BlockSpec((N_VEC_ROWS, LANE), lambda b, ids: (0, 0)),                 # vec slab
        ],
        out_specs=pl.BlockSpec((1, 1, LANE), lambda b, ids: (b, 0, 0)),
        scratch_shapes=[pltpu.VMEM((S, HIDDEN), jnp.float32)],
    )
    # TODO(synk): for real DistilBERT sizes (hidden=768, 6 layers) stream per-layer weights
    # with a layer-axis BlockSpec instead of keeping all layers VMEM-resident.
    out = pl.pallas_call(
        kernel,
        grid_spec=grid_spec,
        out_shape=jax.ShapeDtypeStruct((B, 1, LANE), jnp.float32),
        compiler_params=pltpu.CompilerParams(dimension_semantics=("parallel",)),
    )(ids_flat, params["word_emb"], pos_emb, mask_bias,
      qkv_w, o_w, f1_w, f2_w, cls_w, vec_slab)

    return out[:, 0, :NUM_CLASSES]                                    # (B, 2) f32


if __name__ == "__main__":
    key = jax.random.PRNGKey(0)
    pkey, ikey = jax.random.split(key)
    params = init_params(pkey)

    B, S = 2, 8
    input_ids = jax.random.randint(ikey, (B, S), 0, VOCAB, dtype=jnp.int32)
    attention_mask = jnp.ones((B, S), jnp.int32).at[1, 6:].set(0)  # pad tail of example 1

    logits = jax.jit(transformer_text_classifier)(params, input_ids, attention_mask)
    jax.block_until_ready(logits)
    assert logits.shape == (B, NUM_CLASSES) and logits.dtype == jnp.float32
    assert bool(jnp.all(jnp.isfinite(logits)))
    print("KERNEL_OK")
</pallas_src>

<mosaic_0001>
module attributes {stable_mosaic.version = 11 : i64} {
  func.func @_fused_forward_kernel(%arg0: i32, %arg1: memref<16xi32, #tpu.memory_space<smem>>, %arg2: memref<100x32xf32, #tpu.memory_space<vmem>>, %arg3: memref<8x32xf32, #tpu.memory_space<vmem>>, %arg4: memref<1x1x8xf32, #tpu.memory_space<vmem>>, %arg5: memref<2x32x96xbf16, #tpu.memory_space<vmem>>, %arg6: memref<2x32x32xbf16, #tpu.memory_space<vmem>>, %arg7: memref<2x32x128xbf16, #tpu.memory_space<vmem>>, %arg8: memref<2x128x32xbf16, #tpu.memory_space<vmem>>, %arg9: memref<32x128xbf16, #tpu.memory_space<vmem>>, %arg10: memref<21x128xf32, #tpu.memory_space<vmem>>, %arg11: memref<1x1x128xf32, #tpu.memory_space<vmem>>, %arg12: memref<8x32xf32, #tpu.memory_space<vmem>>) attributes {dimension_semantics = [#tpu.dimension_semantics<parallel>], iteration_bounds = array<i64: 2>, scalar_prefetch = 1 : i64, scratch_operands = 1 : i64, tpu.core_type = #tpu.core_type<tc>, window_params = [{pipeline_mode = #tpu.pipeline_mode<synchronous>, transform_indices = @transform_0, window_bounds = array<i64: 100, 32>}, {pipeline_mode = #tpu.pipeline_mode<synchronous>, transform_indices = @transform_1, window_bounds = array<i64: 8, 32>}, {transform_indices = @transform_2, window_bounds = array<i64: 1, 1, 8>}, {pipeline_mode = #tpu.pipeline_mode<synchronous>, transform_indices = @transform_3, window_bounds = array<i64: 2, 32, 96>}, {pipeline_mode = #tpu.pipeline_mode<synchronous>, transform_indices = @transform_4, window_bounds = array<i64: 2, 32, 32>}, {pipeline_mode = #tpu.pipeline_mode<synchronous>, transform_indices = @transform_5, window_bounds = array<i64: 2, 32, 128>}, {pipeline_mode = #tpu.pipeline_mode<synchronous>, transform_indices = @transform_6, window_bounds = array<i64: 2, 128, 32>}, {pipeline_mode = #tpu.pipeline_mode<synchronous>, transform_indices = @transform_7, window_bounds = array<i64: 32, 128>}, {pipeline_mode = #tpu.pipeline_mode<synchronous>, transform_indices = @transform_8, window_bounds = array<i64: 21, 128>}, {transform_indices = @transform_9, window_bounds = array<i64: 1, 1, 128>}]} {
    %c8_i32 = arith.constant 8 : i32
    %0 = arith.muli %arg0, %c8_i32 : i32
    %c0_i32 = arith.constant 0 : i32
    %1 = arith.addi %0, %c0_i32 : i32
    %2 = arith.index_cast %1 : i32 to index
    %3 = memref.load %arg1[%2] : memref<16xi32, #tpu.memory_space<smem>>
    %4 = arith.index_cast %3 : i32 to index
    %c0 = arith.constant 0 : index
    %5 = vector.load %arg2[%4, %c0] : memref<100x32xf32, #tpu.memory_space<vmem>>, vector<1x32xf32>
    %c0_0 = arith.constant 0 : index
    %c0_1 = arith.constant 0 : index
    %6 = vector.load %arg12[%c0_0, %c0_1] : memref<8x32xf32, #tpu.memory_space<vmem>>, vector<1x32xf32>
    tpu.vector_store %arg12[%c0_0, %c0_1], %5 {strides = array<i32>} : memref<8x32xf32, #tpu.memory_space<vmem>>, vector<1x32xf32>,
    %c8_i32_2 = arith.constant 8 : i32
    %7 = arith.muli %arg0, %c8_i32_2 : i32
    %c1_i32 = arith.constant 1 : i32
    %8 = arith.addi %7, %c1_i32 : i32
    %9 = arith.index_cast %8 : i32 to index
    %10 = memref.load %arg1[%9] : memref<16xi32, #tpu.memory_space<smem>>
    %11 = arith.index_cast %10 : i32 to index
    %c0_3 = arith.constant 0 : index
    %12 = vector.load %arg2[%11, %c0_3] : memref<100x32xf32, #tpu.memory_space<vmem>>, vector<1x32xf32>
    %c1 = arith.constant 1 : index
    %c0_4 = arith.constant 0 : index
    %13 = vector.load %arg12[%c1, %c0_4] : memref<8x32xf32, #tpu.memory_space<vmem>>, vector<1x32xf32>
    tpu.vector_store %arg12[%c1, %c0_4], %12 {strides = array<i32>} : memref<8x32xf32, #tpu.memory_space<vmem>>, vector<1x32xf32>,
    %c8_i32_5 = arith.constant 8 : i32
    %14 = arith.muli %arg0, %c8_i32_5 : i32
    %c2_i32 = arith.constant 2 : i32
    %15 = arith.addi %14, %c2_i32 : i32
    %16 = arith.index_cast %15 : i32 to index
    %17 = memref.load %arg1[%16] : memref<16xi32, #tpu.memory_space<smem>>
    %18 = arith.index_cast %17 : i32 to index
    %c0_6 = arith.constant 0 : index
    %19 = vector.load %arg2[%18, %c0_6] : memref<100x32xf32, #tpu.memory_space<vmem>>, vector<1x32xf32>
    %c2 = arith.constant 2 : index
    %c0_7 = arith.constant 0 : index
    %20 = vector.load %arg12[%c2, %c0_7] : memref<8x32xf32, #tpu.memory_space<vmem>>, vector<1x32xf32>
    tpu.vector_store %arg12[%c2, %c0_7], %19 {strides = array<i32>} : memref<8x32xf32, #tpu.memory_space<vmem>>, vector<1x32xf32>,
    %c8_i32_8 = arith.constant 8 : i32
    %21 = arith.muli %arg0, %c8_i32_8 : i32
    %c3_i32 = arith.constant 3 : i32
    %22 = arith.addi %21, %c3_i32 : i32
    %23 = arith.index_cast %22 : i32 to index
    %24 = memref.load %arg1[%23] : memref<16xi32, #tpu.memory_space<smem>>
    %25 = arith.index_cast %24 : i32 to index
    %c0_9 = arith.constant 0 : index
    %26 = vector.load %arg2[%25, %c0_9] : memref<100x32xf32, #tpu.memory_space<vmem>>, vector<1x32xf32>
    %c3 = arith.constant 3 : index
    %c0_10 = arith.constant 0 : index
    %27 = vector.load %arg12[%c3, %c0_10] : memref<8x32xf32, #tpu.memory_space<vmem>>, vector<1x32xf32>
    tpu.vector_store %arg12[%c3, %c0_10], %26 {strides = array<i32>} : memref<8x32xf32, #tpu.memory_space<vmem>>, vector<1x32xf32>,
    %c8_i32_11 = arith.constant 8 : i32
    %28 = arith.muli %arg0, %c8_i32_11 : i32
    %c4_i32 = arith.constant 4 : i32
    %29 = arith.addi %28, %c4_i32 : i32
    %30 = arith.index_cast %29 : i32 to index
    %31 = memref.load %arg1[%30] : memref<16xi32, #tpu.memory_space<smem>>
    %32 = arith.index_cast %31 : i32 to index
    %c0_12 = arith.constant 0 : index
    %33 = vector.load %arg2[%32, %c0_12] : memref<100x32xf32, #tpu.memory_space<vmem>>, vector<1x32xf32>
    %c4 = arith.constant 4 : index
    %c0_13 = arith.constant 0 : index
    %34 = vector.load %arg12[%c4, %c0_13] : memref<8x32xf32, #tpu.memory_space<vmem>>, vector<1x32xf32>
    tpu.vector_store %arg12[%c4, %c0_13], %33 {strides = array<i32>} : memref<8x32xf32, #tpu.memory_space<vmem>>, vector<1x32xf32>,
    %c8_i32_14 = arith.constant 8 : i32
    %35 = arith.muli %arg0, %c8_i32_14 : i32
    %c5_i32 = arith.constant 5 : i32
    %36 = arith.addi %35, %c5_i32 : i32
    %37 = arith.index_cast %36 : i32 to index
    %38 = memref.load %arg1[%37] : memref<16xi32, #tpu.memory_space<smem>>
    %39 = arith.index_cast %38 : i32 to index
    %c0_15 = arith.constant 0 : index
    %40 = vector.load %arg2[%39, %c0_15] : memref<100x32xf32, #tpu.memory_space<vmem>>, vector<1x32xf32>
    %c5 = arith.constant 5 : index
    %c0_16 = arith.constant 0 : index
    %41 = vector.load %arg12[%c5, %c0_16] : memref<8x32xf32, #tpu.memory_space<vmem>>, vector<1x32xf32>
    tpu.vector_store %arg12[%c5, %c0_16], %40 {strides = array<i32>} : memref<8x32xf32, #tpu.memory_space<vmem>>, vector<1x32xf32>,
    %c8_i32_17 = arith.constant 8 : i32
    %42 = arith.muli %arg0, %c8_i32_17 : i32
    %c6_i32 = arith.constant 6 : i32
    %43 = arith.addi %42, %c6_i32 : i32
    %44 = arith.index_cast %43 : i32 to index
    %45 = memref.load %arg1[%44] : memref<16xi32, #tpu.memory_space<smem>>
    %46 = arith.index_cast %45 : i32 to index
    %c0_18 = arith.constant 0 : index
    %47 = vector.load %arg2[%46, %c0_18] : memref<100x32xf32, #tpu.memory_space<vmem>>, vector<1x32xf32>
    %c6 = arith.constant 6 : index
    %c0_19 = arith.constant 0 : index
    %48 = vector.load %arg12[%c6, %c0_19] : memref<8x32xf32, #tpu.memory_space<vmem>>, vector<1x32xf32>
    tpu.vector_store %arg12[%c6, %c0_19], %47 {strides = array<i32>} : memref<8x32xf32, #tpu.memory_space<vmem>>, vector<1x32xf32>,
    %c8_i32_20 = arith.constant 8 : i32
    %49 = arith.muli %arg0, %c8_i32_20 : i32
    %c7_i32 = arith.constant 7 : i32
    %50 = arith.addi %49, %c7_i32 : i32
    %51 = arith.index_cast %50 : i32 to index
    %52 = memref.load %arg1[%51] : memref<16xi32, #tpu.memory_space<smem>>
    %53 = arith.index_cast %52 : i32 to index
    %c0_21 = arith.constant 0 : index
    %54 = vector.load %arg2[%53, %c0_21] : memref<100x32xf32, #tpu.memory_space<vmem>>, vector<1x32xf32>
    %c7 = arith.constant 7 : index
    %c0_22 = arith.constant 0 : index
    %55 = vector.load %arg12[%c7, %c0_22] : memref<8x32xf32, #tpu.memory_space<vmem>>, vector<1x32xf32>
    tpu.vector_store %arg12[%c7, %c0_22], %54 {strides = array<i32>} : memref<8x32xf32, #tpu.memory_space<vmem>>, vector<1x32xf32>,
    %c0_23 = arith.constant 0 : index
    %c0_24 = arith.constant 0 : index
    %56 = vector.load %arg12[%c0_23, %c0_24] : memref<8x32xf32, #tpu.memory_space<vmem>>, vector<8x32xf32>
    %c0_25 = arith.constant 0 : index
    %c0_26 = arith.constant 0 : index
    %57 = vector.load %arg3[%c0_25, %c0_26] : memref<8x32xf32, #tpu.memory_space<vmem>>, vector<8x32xf32>
    %58 = arith.addf %56, %57 : vector<8x32xf32>
    %cst = arith.constant dense<0.000000e+00> : vector<8xf32>
    %59 = vector.multi_reduction <add>, %58, %cst [1] : vector<8x32xf32> to vector<8xf32>
    %60 = vector.shape_cast %59 : vector<8xf32> to vector<8x1xf32>
    %cst_27 = arith.constant 3.200000e+01 : f32
    %61 = vector.broadcast %cst_27 : f32 to vector<8x1xf32>
    %62 = arith.divf %60, %61 : vector<8x1xf32>
    %63 = vector.broadcast %62 : vector<8x1xf32> to vector<8x32xf32>
    %64 = arith.subf %58, %63 : vector<8x32xf32>
    %65 = arith.mulf %64, %64 : vector<8x32xf32>
    %cst_28 = arith.constant dense<0.000000e+00> : vector<8xf32>
    %66 = vector.multi_reduction <add>, %65, %cst_28 [1] : vector<8x32xf32> to vector<8xf32>
    %67 = vector.shape_cast %66 : vector<8xf32> to vector<8x1xf32>
    %cst_29 = arith.constant 3.200000e+01 : f32
    %68 = vector.broadcast %cst_29 : f32 to vector<8x1xf32>
    %69 = arith.divf %67, %68 : vector<8x1xf32>
    %70 = vector.broadcast %62 : vector<8x1xf32> to vector<8x32xf32>
    %71 = arith.subf %58, %70 : vector<8x32xf32>
    %cst_30 = arith.constant 9.99999996E-13 : f32
    %72 = vector.broadcast %cst_30 : f32 to vector<8x1xf32>
    %73 = arith.addf %69, %72 : vector<8x1xf32>
    %74 = math.rsqrt %73 : vector<8x1xf32>
    %75 = vector.broadcast %74 : vector<8x1xf32> to vector<8x32xf32>
    %76 = arith.mulf %71, %75 : vector<8x32xf32>
    %c0_31 = arith.constant 0 : index
    %c0_32 = arith.constant 0 : index
    %77 = vector.load %arg10[%c0_31, %c0_32] : memref<21x128xf32, #tpu.memory_space<vmem>>, vector<1x32xf32>
    %78 = vector.broadcast %77 : vector<1x32xf32> to vector<8x32xf32>
    %79 = arith.mulf %76, %78 : vector<8x32xf32>
    %c1_33 = arith.constant 1 : index
    %c0_34 = arith.constant 0 : index
    %80 = vector.load %arg10[%c1_33, %c0_34] : memref<21x128xf32, #tpu.memory_space<vmem>>, vector<1x32xf32>
    %81 = vector.broadcast %80 : vector<1x32xf32> to vector<8x32xf32>
    %82 = arith.addf %79, %81 : vector<8x32xf32>
    %c0_35 = arith.constant 0 : index
    %c0_36 = arith.constant 0 : index
    %c0_37 = arith.constant 0 : index
    %83 = vector.load %arg4[%c0_35, %c0_36, %c0_37] : memref<1x1x8xf32, #tpu.memory_space<vmem>>, vector<1x1x8xf32>
    %84 = arith.truncf %82 : vector<8x32xf32> to vector<8x32xbf16>
    %c0_38 = arith.constant 0 : index
    %c0_39 = arith.constant 0 : index
    %c0_40 = arith.constant 0 : index
    %85 = vector.load %arg5[%c0_38, %c0_39, %c0_40] : memref<2x32x96xbf16, #tpu.memory_space<vmem>>, vector<1x32x96xbf16>
    %86 = vector.shape_cast %85 : vector<1x32x96xbf16> to vector<32x96xbf16>
    %cst_41 = arith.constant dense<0.000000e+00> : vector<8x96xf32>
    %87 = tpu.matmul %84, %86, %cst_41 {dimension_numbers = #tpu.dot_dimension_numbers<[1], [0], [0], [1], [0, 0, 1, 1], [], []>} : vector<8x32xbf16>, vector<32x96xbf16>, vector<8x96xf32> -> vector<8x96xf32>
    %c5_42 = arith.constant 5 : index
    %c0_43 = arith.constant 0 : index
    %88 = vector.load %arg10[%c5_42, %c0_43] : memref<21x128xf32, #tpu.memory_space<vmem>>, vector<1x96xf32>
    %89 = vector.broadcast %88 : vector<1x96xf32> to vector<8x96xf32>
    %90 = arith.addf %87, %89 : vector<8x96xf32>
    %91 = vector.extract_strided_slice %90 {offsets = [0, 0], sizes = [8, 32], strides = [1, 1]} : vector<8x96xf32> to vector<8x32xf32>
    %92 = vector.shape_cast %91 : vector<8x32xf32> to vector<8x4x8xf32>
    %93 = vector.extract_strided_slice %90 {offsets = [0, 32], sizes = [8, 32], strides = [1, 1]} : vector<8x96xf32> to vector<8x32xf32>
    %94 = vector.shape_cast %93 : vector<8x32xf32> to vector<8x4x8xf32>
    %95 = vector.extract_strided_slice %90 {offsets = [0, 64], sizes = [8, 32], strides = [1, 1]} : vector<8x96xf32> to vector<8x32xf32>
    %96 = vector.shape_cast %95 : vector<8x32xf32> to vector<8x4x8xf32>
    "tpu.trace_start"() <{level = 10 : i32, message = "qhd,khd->hqk"}> : () -> ()
    %cst_44 = arith.constant dense<0.000000e+00> : vector<4x8x8xf32>
    %97 = tpu.matmul %92, %94, %cst_44 {dimension_numbers = #tpu.dot_dimension_numbers<[2], [2], [0], [0], [0, 1, 0, 0, 1, 0], [1], [1]>} : vector<8x4x8xf32>, vector<8x4x8xf32>, vector<4x8x8xf32> -> vector<4x8x8xf32>
    "tpu.trace_stop"() : () -> ()
    %98 = vector.broadcast %83 : vector<1x1x8xf32> to vector<4x8x8xf32>
    %99 = arith.addf %97, %98 : vector<4x8x8xf32>
    %cst_45 = arith.constant dense<0xFF800000> : vector<4x8xf32>
    %100 = vector.multi_reduction <maximumf>, %99, %cst_45 [2] : vector<4x8x8xf32> to vector<4x8xf32>
    %101 = vector.shape_cast %100 : vector<4x8xf32> to vector<4x8x1xf32>
    %102 = vector.broadcast %101 : vector<4x8x1xf32> to vector<4x8x8xf32>
    %103 = arith.subf %99, %102 : vector<4x8x8xf32>
    %104 = math.exp %103 : vector<4x8x8xf32>
    %cst_46 = arith.constant dense<0.000000e+00> : vector<4x8xf32>
    %105 = vector.multi_reduction <add>, %104, %cst_46 [2] : vector<4x8x8xf32> to vector<4x8xf32>
    %106 = vector.shape_cast %105 : vector<4x8xf32> to vector<4x8x1xf32>
    %107 = tpu.reciprocal %106 {approx = true} : vector<4x8x1xf32> -> vector<4x8x1xf32>
    %108 = vector.broadcast %107 : vector<4x8x1xf32> to vector<4x8x8xf32>
    %109 = arith.mulf %104, %108 : vector<4x8x8xf32>
    "tpu.trace_start"() <{level = 10 : i32, message = "hqk,khd->qhd"}> : () -> ()
    %cst_47 = arith.constant dense<0.000000e+00> : vector<4x8x8xf32>
    %110 = tpu.matmul %96, %109, %cst_47 {dimension_numbers = #tpu.dot_dimension_numbers<[0], [2], [2], [1], [0, 1, 0, 2, 1, 1], [1], [0]>} : vector<8x4x8xf32>, vector<4x8x8xf32>, vector<4x8x8xf32> -> vector<4x8x8xf32>
    %111 = tpu.transpose %110, [2, 0, 1] : vector<4x8x8xf32> -> vector<8x4x8xf32>
    "tpu.trace_stop"() : () -> ()
    %112 = vector.shape_cast %111 : vector<8x4x8xf32> to vector<8x32xf32>
    %113 = arith.truncf %112 : vector<8x32xf32> to vector<8x32xbf16>
    %c0_48 = arith.constant 0 : index
    %c0_49 = arith.constant 0 : index
    %c0_50 = arith.constant 0 : index
    %114 = vector.load %arg6[%c0_48, %c0_49, %c0_50] : memref<2x32x32xbf16, #tpu.memory_space<vmem>>, vector<1x32x32xbf16>
    %115 = vector.shape_cast %114 : vector<1x32x32xbf16> to vector<32x32xbf16>
    %cst_51 = arith.constant dense<0.000000e+00> : vector<8x32xf32>
    %116 = tpu.matmul %113, %115, %cst_51 {dimension_numbers = #tpu.dot_dimension_numbers<[1], [0], [0], [1], [0, 0, 1, 1], [], []>} : vector<8x32xbf16>, vector<32x32xbf16>, vector<8x32xf32> -> vector<8x32xf32>
    %c6_52 = arith.constant 6 : index
    %c0_53 = arith.constant 0 : index
    %117 = vector.load %arg10[%c6_52, %c0_53] : memref<21x128xf32, #tpu.memory_space<vmem>>, vector<1x32xf32>
    %118 = vector.broadcast %117 : vector<1x32xf32> to vector<8x32xf32>
    %119 = arith.addf %116, %118 : vector<8x32xf32>
    %120 = arith.addf %119, %82 : vector<8x32xf32>
    %cst_54 = arith.constant dense<0.000000e+00> : vector<8xf32>
    %121 = vector.multi_reduction <add>, %120, %cst_54 [1] : vector<8x32xf32> to vector<8xf32>
    %122 = vector.shape_cast %121 : vector<8xf32> to vector<8x1xf32>
    %cst_55 = arith.constant 3.200000e+01 : f32
    %123 = vector.broadcast %cst_55 : f32 to vector<8x1xf32>
    %124 = arith.divf %122, %123 : vector<8x1xf32>
    %125 = vector.broadcast %124 : vector<8x1xf32> to vector<8x32xf32>
    %126 = arith.subf %120, %125 : vector<8x32xf32>
    %127 = arith.mulf %126, %126 : vector<8x32xf32>
    %cst_56 = arith.constant dense<0.000000e+00> : vector<8xf32>
    %128 = vector.multi_reduction <add>, %127, %cst_56 [1] : vector<8x32xf32> to vector<8xf32>
    %129 = vector.shape_cast %128 : vector<8xf32> to vector<8x1xf32>
    %cst_57 = arith.constant 3.200000e+01 : f32
    %130 = vector.broadcast %cst_57 : f32 to vector<8x1xf32>
    %131 = arith.divf %129, %130 : vector<8x1xf32>
    %132 = vector.broadcast %124 : vector<8x1xf32> to vector<8x32xf32>
    %133 = arith.subf %120, %132 : vector<8x32xf32>
    %cst_58 = arith.constant 9.99999996E-13 : f32
    %134 = vector.broadcast %cst_58 : f32 to vector<8x1xf32>
    %135 = arith.addf %131, %134 : vector<8x1xf32>
    %136 = math.rsqrt %135 : vector<8x1xf32>
    %137 = vector.broadcast %136 : vector<8x1xf32> to vector<8x32xf32>
    %138 = arith.mulf %133, %137 : vector<8x32xf32>
    %c7_59 = arith.constant 7 : index
    %c0_60 = arith.constant 0 : index
    %139 = vector.load %arg10[%c7_59, %c0_60] : memref<21x128xf32, #tpu.memory_space<vmem>>, vector<1x32xf32>
    %140 = vector.broadcast %139 : vector<1x32xf32> to vector<8x32xf32>
    %141 = arith.mulf %138, %140 : vector<8x32xf32>
    %c8 = arith.constant 8 : index
    %c0_61 = arith.constant 0 : index
    %142 = vector.load %arg10[%c8, %c0_61] : memref<21x128xf32, #tpu.memory_space<vmem>>, vector<1x32xf32>
    %143 = vector.broadcast %142 : vector<1x32xf32> to vector<8x32xf32>
    %144 = arith.addf %141, %143 : vector<8x32xf32>
    %145 = arith.truncf %144 : vector<8x32xf32> to vector<8x32xbf16>
    %c0_62 = arith.constant 0 : index
    %c0_63 = arith.constant 0 : index
    %c0_64 = arith.constant 0 : index
    %146 = vector.load %arg7[%c0_62, %c0_63, %c0_64] : memref<2x32x128xbf16, #tpu.memory_space<vmem>>, vector<1x32x128xbf16>
    %147 = vector.shape_cast %146 : vector<1x32x128xbf16> to vector<32x128xbf16>
    %cst_65 = arith.constant dense<0.000000e+00> : vector<8x128xf32>
    %148 = tpu.matmul %145, %147, %cst_65 {dimension_numbers = #tpu.dot_dimension_numbers<[1], [0], [0], [1], [0, 0, 1, 1], [], []>} : vector<8x32xbf16>, vector<32x128xbf16>, vector<8x128xf32> -> vector<8x128xf32>
    %c9 = arith.constant 9 : index
    %c0_66 = arith.constant 0 : index
    %149 = vector.load %arg10[%c9, %c0_66] : memref<21x128xf32, #tpu.memory_space<vmem>>, vector<1x128xf32>
    %150 = vector.broadcast %149 : vector<1x128xf32> to vector<8x128xf32>
    %151 = arith.addf %148, %150 : vector<8x128xf32>
    %cst_67 = arith.constant 5.000000e-01 : f32
    %152 = vector.broadcast %cst_67 : f32 to vector<8x128xf32>
    %153 = arith.mulf %152, %151 : vector<8x128xf32>
    %154 = arith.mulf %151, %151 : vector<8x128xf32>
    %155 = arith.mulf %154, %151 : vector<8x128xf32>
    %cst_68 = arith.constant 4.471500e-02 : f32
    %156 = vector.broadcast %cst_68 : f32 to vector<8x128xf32>
    %157 = arith.mulf %156, %155 : vector<8x128xf32>
    %158 = arith.addf %151, %157 : vector<8x128xf32>
    %cst_69 = arith.constant 0.797884583 : f32
    %159 = vector.broadcast %cst_69 : f32 to vector<8x128xf32>
    %160 = arith.mulf %159, %158 : vector<8x128xf32>
    %161 = math.tanh %160 : vector<8x128xf32>
    %cst_70 = arith.constant 1.000000e+00 : f32
    %162 = vector.broadcast %cst_70 : f32 to vector<8x128xf32>
    %163 = arith.addf %162, %161 : vector<8x128xf32>
    %164 = arith.mulf %153, %163 : vector<8x128xf32>
    %165 = arith.truncf %164 : vector<8x128xf32> to vector<8x128xbf16>
    %c0_71 = arith.constant 0 : index
    %c0_72 = arith.constant 0 : index
    %c0_73 = arith.constant 0 : index
    %166 = vector.load %arg8[%c0_71, %c0_72, %c0_73] : memref<2x128x32xbf16, #tpu.memory_space<vmem>>, vector<1x128x32xbf16>
    %167 = vector.shape_cast %166 : vector<1x128x32xbf16> to vector<128x32xbf16>
    %cst_74 = arith.constant dense<0.000000e+00> : vector<8x32xf32>
    %168 = tpu.matmul %165, %167, %cst_74 {dimension_numbers = #tpu.dot_dimension_numbers<[1], [0], [0], [1], [0, 0, 1, 1], [], []>} : vector<8x128xbf16>, vector<128x32xbf16>, vector<8x32xf32> -> vector<8x32xf32>
    %c10 = arith.constant 10 : index
    %c0_75 = arith.constant 0 : index
    %169 = vector.load %arg10[%c10, %c0_75] : memref<21x128xf32, #tpu.memory_space<vmem>>, vector<1x32xf32>
    %170 = vector.broadcast %169 : vector<1x32xf32> to vector<8x32xf32>
    %171 = arith.addf %168, %170 : vector<8x32xf32>
    %172 = arith.addf %171, %144 : vector<8x32xf32>
    %cst_76 = arith.constant dense<0.000000e+00> : vector<8xf32>
    %173 = vector.multi_reduction <add>, %172, %cst_76 [1] : vector<8x32xf32> to vector<8xf32>
    %174 = vector.shape_cast %173 : vector<8xf32> to vector<8x1xf32>
    %cst_77 = arith.constant 3.200000e+01 : f32
    %175 = vector.broadcast %cst_77 : f32 to vector<8x1xf32>
    %176 = arith.divf %174, %175 : vector<8x1xf32>
    %177 = vector.broadcast %176 : vector<8x1xf32> to vector<8x32xf32>
    %178 = arith.subf %172, %177 : vector<8x32xf32>
    %179 = arith.mulf %178, %178 : vector<8x32xf32>
    %cst_78 = arith.constant dense<0.000000e+00> : vector<8xf32>
    %180 = vector.multi_reduction <add>, %179, %cst_78 [1] : vector<8x32xf32> to vector<8xf32>
    %181 = vector.shape_cast %180 : vector<8xf32> to vector<8x1xf32>
    %cst_79 = arith.constant 3.200000e+01 : f32
    %182 = vector.broadcast %cst_79 : f32 to vector<8x1xf32>
    %183 = arith.divf %181, %182 : vector<8x1xf32>
    %184 = vector.broadcast %176 : vector<8x1xf32> to vector<8x32xf32>
    %185 = arith.subf %172, %184 : vector<8x32xf32>
    %cst_80 = arith.constant 9.99999996E-13 : f32
    %186 = vector.broadcast %cst_80 : f32 to vector<8x1xf32>
    %187 = arith.addf %183, %186 : vector<8x1xf32>
    %188 = math.rsqrt %187 : vector<8x1xf32>
    %189 = vector.broadcast %188 : vector<8x1xf32> to vector<8x32xf32>
    %190 = arith.mulf %185, %189 : vector<8x32xf32>
    %c11 = arith.constant 11 : index
    %c0_81 = arith.constant 0 : index
    %191 = vector.load %arg10[%c11, %c0_81] : memref<21x128xf32, #tpu.memory_space<vmem>>, vector<1x32xf32>
    %192 = vector.broadcast %191 : vector<1x32xf32> to vector<8x32xf32>
    %193 = arith.mulf %190, %192 : vector<8x32xf32>
    %c12 = arith.constant 12 : index
    %c0_82 = arith.constant 0 : index
    %194 = vector.load %arg10[%c12, %c0_82] : memref<21x128xf32, #tpu.memory_space<vmem>>, vector<1x32xf32>
    %195 = vector.broadcast %194 : vector<1x32xf32> to vector<8x32xf32>
    %196 = arith.addf %193, %195 : vector<8x32xf32>
    %197 = arith.truncf %196 : vector<8x32xf32> to vector<8x32xbf16>
    %c1_83 = arith.constant 1 : index
    %c0_84 = arith.constant 0 : index
    %c0_85 = arith.constant 0 : index
    %198 = vector.load %arg5[%c1_83, %c0_84, %c0_85] : memref<2x32x96xbf16, #tpu.memory_space<vmem>>, vector<1x32x96xbf16>
    %199 = vector.shape_cast %198 : vector<1x32x96xbf16> to vector<32x96xbf16>
    %cst_86 = arith.constant dense<0.000000e+00> : vector<8x96xf32>
    %200 = tpu.matmul %197, %199, %cst_86 {dimension_numbers = #tpu.dot_dimension_numbers<[1], [0], [0], [1], [0, 0, 1, 1], [], []>} : vector<8x32xbf16>, vector<32x96xbf16>, vector<8x96xf32> -> vector<8x96xf32>
    %c13 = arith.constant 13 : index
    %c0_87 = arith.constant 0 : index
    %201 = vector.load %arg10[%c13, %c0_87] : memref<21x128xf32, #tpu.memory_space<vmem>>, vector<1x96xf32>
    %202 = vector.broadcast %201 : vector<1x96xf32> to vector<8x96xf32>
    %203 = arith.addf %200, %202 : vector<8x96xf32>
    %204 = vector.extract_strided_slice %203 {offsets = [0, 0], sizes = [8, 32], strides = [1, 1]} : vector<8x96xf32> to vector<8x32xf32>
    %205 = vector.shape_cast %204 : vector<8x32xf32> to vector<8x4x8xf32>
    %206 = vector.extract_strided_slice %203 {offsets = [0, 32], sizes = [8, 32], strides = [1, 1]} : vector<8x96xf32> to vector<8x32xf32>
    %207 = vector.shape_cast %206 : vector<8x32xf32> to vector<8x4x8xf32>
    %208 = vector.extract_strided_slice %203 {offsets = [0, 64], sizes = [8, 32], strides = [1, 1]} : vector<8x96xf32> to vector<8x32xf32>
    %209 = vector.shape_cast %208 : vector<8x32xf32> to vector<8x4x8xf32>
    "tpu.trace_start"() <{level = 10 : i32, message = "qhd,khd->hqk"}> : () -> ()
    %cst_88 = arith.constant dense<0.000000e+00> : vector<4x8x8xf32>
    %210 = tpu.matmul %205, %207, %cst_88 {dimension_numbers = #tpu.dot_dimension_numbers<[2], [2], [0], [0], [0, 1, 0, 0, 1, 0], [1], [1]>} : vector<8x4x8xf32>, vector<8x4x8xf32>, vector<4x8x8xf32> -> vector<4x8x8xf32>
    "tpu.trace_stop"() : () -> ()
    %211 = vector.broadcast %83 : vector<1x1x8xf32> to vector<4x8x8xf32>
    %212 = arith.addf %210, %211 : vector<4x8x8xf32>
    %cst_89 = arith.constant dense<0xFF800000> : vector<4x8xf32>
    %213 = vector.multi_reduction <maximumf>, %212, %cst_89 [2] : vector<4x8x8xf32> to vector<4x8xf32>
    %214 = vector.shape_cast %213 : vector<4x8xf32> to vector<4x8x1xf32>
    %215 = vector.broadcast %214 : vector<4x8x1xf32> to vector<4x8x8xf32>
    %216 = arith.subf %212, %215 : vector<4x8x8xf32>
    %217 = math.exp %216 : vector<4x8x8xf32>
    %cst_90 = arith.constant dense<0.000000e+00> : vector<4x8xf32>
    %218 = vector.multi_reduction <add>, %217, %cst_90 [2] : vector<4x8x8xf32> to vector<4x8xf32>
    %219 = vector.shape_cast %218 : vector<4x8xf32> to vector<4x8x1xf32>
    %220 = tpu.reciprocal %219 {approx = true} : vector<4x8x1xf32> -> vector<4x8x1xf32>
    %221 = vector.broadcast %220 : vector<4x8x1xf32> to vector<4x8x8xf32>
    %222 = arith.mulf %217, %221 : vector<4x8x8xf32>
    "tpu.trace_start"() <{level = 10 : i32, message = "hqk,khd->qhd"}> : () -> ()
    %cst_91 = arith.constant dense<0.000000e+00> : vector<4x8x8xf32>
    %223 = tpu.matmul %209, %222, %cst_91 {dimension_numbers = #tpu.dot_dimension_numbers<[0], [2], [2], [1], [0, 1, 0, 2, 1, 1], [1], [0]>} : vector<8x4x8xf32>, vector<4x8x8xf32>, vector<4x8x8xf32> -> vector<4x8x8xf32>
    %224 = tpu.transpose %223, [2, 0, 1] : vector<4x8x8xf32> -> vector<8x4x8xf32>
    "tpu.trace_stop"() : () -> ()
    %225 = vector.shape_cast %224 : vector<8x4x8xf32> to vector<8x32xf32>
    %226 = arith.truncf %225 : vector<8x32xf32> to vector<8x32xbf16>
    %c1_92 = arith.constant 1 : index
    %c0_93 = arith.constant 0 : index
    %c0_94 = arith.constant 0 : index
    %227 = vector.load %arg6[%c1_92, %c0_93, %c0_94] : memref<2x32x32xbf16, #tpu.memory_space<vmem>>, vector<1x32x32xbf16>
    %228 = vector.shape_cast %227 : vector<1x32x32xbf16> to vector<32x32xbf16>
    %cst_95 = arith.constant dense<0.000000e+00> : vector<8x32xf32>
    %229 = tpu.matmul %226, %228, %cst_95 {dimension_numbers = #tpu.dot_dimension_numbers<[1], [0], [0], [1], [0, 0, 1, 1], [], []>} : vector<8x32xbf16>, vector<32x32xbf16>, vector<8x32xf32> -> vector<8x32xf32>
    %c14 = arith.constant 14 : index
    %c0_96 = arith.constant 0 : index
    %230 = vector.load %arg10[%c14, %c0_96] : memref<21x128xf32, #tpu.memory_space<vmem>>, vector<1x32xf32>
    %231 = vector.broadcast %230 : vector<1x32xf32> to vector<8x32xf32>
    %232 = arith.addf %229, %231 : vector<8x32xf32>
    %233 = arith.addf %232, %196 : vector<8x32xf32>
    %cst_97 = arith.constant dense<0.000000e+00> : vector<8xf32>
    %234 = vector.multi_reduction <add>, %233, %cst_97 [1] : vector<8x32xf32> to vector<8xf32>
    %235 = vector.shape_cast %234 : vector<8xf32> to vector<8x1xf32>
    %cst_98 = arith.constant 3.200000e+01 : f32
    %236 = vector.broadcast %cst_98 : f32 to vector<8x1xf32>
    %237 = arith.divf %235, %236 : vector<8x1xf32>
    %238 = vector.broadcast %237 : vector<8x1xf32> to vector<8x32xf32>
    %239 = arith.subf %233, %238 : vector<8x32xf32>
    %240 = arith.mulf %239, %239 : vector<8x32xf32>
    %cst_99 = arith.constant dense<0.000000e+00> : vector<8xf32>
    %241 = vector.multi_reduction <add>, %240, %cst_99 [1] : vector<8x32xf32> to vector<8xf32>
    %242 = vector.shape_cast %241 : vector<8xf32> to vector<8x1xf32>
    %cst_100 = arith.constant 3.200000e+01 : f32
    %243 = vector.broadcast %cst_100 : f32 to vector<8x1xf32>
    %244 = arith.divf %242, %243 : vector<8x1xf32>
    %245 = vector.broadcast %237 : vector<8x1xf32> to vector<8x32xf32>
    %246 = arith.subf %233, %245 : vector<8x32xf32>
    %cst_101 = arith.constant 9.99999996E-13 : f32
    %247 = vector.broadcast %cst_101 : f32 to vector<8x1xf32>
    %248 = arith.addf %244, %247 : vector<8x1xf32>
    %249 = math.rsqrt %248 : vector<8x1xf32>
    %250 = vector.broadcast %249 : vector<8x1xf32> to vector<8x32xf32>
    %251 = arith.mulf %246, %250 : vector<8x32xf32>
    %c15 = arith.constant 15 : index
    %c0_102 = arith.constant 0 : index
    %252 = vector.load %arg10[%c15, %c0_102] : memref<21x128xf32, #tpu.memory_space<vmem>>, vector<1x32xf32>
    %253 = vector.broadcast %252 : vector<1x32xf32> to vector<8x32xf32>
    %254 = arith.mulf %251, %253 : vector<8x32xf32>
    %c16 = arith.constant 16 : index
    %c0_103 = arith.constant 0 : index
    %255 = vector.load %arg10[%c16, %c0_103] : memref<21x128xf32, #tpu.memory_space<vmem>>, vector<1x32xf32>
    %256 = vector.broadcast %255 : vector<1x32xf32> to vector<8x32xf32>
    %257 = arith.addf %254, %256 : vector<8x32xf32>
    %258 = arith.truncf %257 : vector<8x32xf32> to vector<8x32xbf16>
    %c1_104 = arith.constant 1 : index
    %c0_105 = arith.constant 0 : index
    %c0_106 = arith.constant 0 : index
    %259 = vector.load %arg7[%c1_104, %c0_105, %c0_106] : memref<2x32x128xbf16, #tpu.memory_space<vmem>>, vector<1x32x128xbf16>
    %260 = vector.shape_cast %259 : vector<1x32x128xbf16> to vector<32x128xbf16>
    %cst_107 = arith.constant dense<0.000000e+00> : vector<8x128xf32>
    %261 = tpu.matmul %258, %260, %cst_107 {dimension_numbers = #tpu.dot_dimension_numbers<[1], [0], [0], [1], [0, 0, 1, 1], [], []>} : vector<8x32xbf16>, vector<32x128xbf16>, vector<8x128xf32> -> vector<8x128xf32>
    %c17 = arith.constant 17 : index
    %c0_108 = arith.constant 0 : index
    %262 = vector.load %arg10[%c17, %c0_108] : memref<21x128xf32, #tpu.memory_space<vmem>>, vector<1x128xf32>
    %263 = vector.broadcast %262 : vector<1x128xf32> to vector<8x128xf32>
    %264 = arith.addf %261, %263 : vector<8x128xf32>
    %cst_109 = arith.constant 5.000000e-01 : f32
    %265 = vector.broadcast %cst_109 : f32 to vector<8x128xf32>
    %266 = arith.mulf %265, %264 : vector<8x128xf32>
    %267 = arith.mulf %264, %264 : vector<8x128xf32>
    %268 = arith.mulf %267, %264 : vector<8x128xf32>
    %cst_110 = arith.constant 4.471500e-02 : f32
    %269 = vector.broadcast %cst_110 : f32 to vector<8x128xf32>
    %270 = arith.mulf %269, %268 : vector<8x128xf32>
    %271 = arith.addf %264, %270 : vector<8x128xf32>
    %cst_111 = arith.constant 0.797884583 : f32
    %272 = vector.broadcast %cst_111 : f32 to vector<8x128xf32>
    %273 = arith.mulf %272, %271 : vector<8x128xf32>
    %274 = math.tanh %273 : vector<8x128xf32>
    %cst_112 = arith.constant 1.000000e+00 : f32
    %275 = vector.broadcast %cst_112 : f32 to vector<8x128xf32>
    %276 = arith.addf %275, %274 : vector<8x128xf32>
    %277 = arith.mulf %266, %276 : vector<8x128xf32>
    %278 = arith.truncf %277 : vector<8x128xf32> to vector<8x128xbf16>
    %c1_113 = arith.constant 1 : index
    %c0_114 = arith.constant 0 : index
    %c0_115 = arith.constant 0 : index
    %279 = vector.load %arg8[%c1_113, %c0_114, %c0_115] : memref<2x128x32xbf16, #tpu.memory_space<vmem>>, vector<1x128x32xbf16>
    %280 = vector.shape_cast %279 : vector<1x128x32xbf16> to vector<128x32xbf16>
    %cst_116 = arith.constant dense<0.000000e+00> : vector<8x32xf32>
    %281 = tpu.matmul %278, %280, %cst_116 {dimension_numbers = #tpu.dot_dimension_numbers<[1], [0], [0], [1], [0, 0, 1, 1], [], []>} : vector<8x128xbf16>, vector<128x32xbf16>, vector<8x32xf32> -> vector<8x32xf32>
    %c18 = arith.constant 18 : index
    %c0_117 = arith.constant 0 : index
    %282 = vector.load %arg10[%c18, %c0_117] : memref<21x128xf32, #tpu.memory_space<vmem>>, vector<1x32xf32>
    %283 = vector.broadcast %282 : vector<1x32xf32> to vector<8x32xf32>
    %284 = arith.addf %281, %283 : vector<8x32xf32>
    %285 = arith.addf %284, %257 : vector<8x32xf32>
    %cst_118 = arith.constant dense<0.000000e+00> : vector<8xf32>
    %286 = vector.multi_reduction <add>, %285, %cst_118 [1] : vector<8x32xf32> to vector<8xf32>
    %287 = vector.shape_cast %286 : vector<8xf32> to vector<8x1xf32>
    %cst_119 = arith.constant 3.200000e+01 : f32
    %288 = vector.broadcast %cst_119 : f32 to vector<8x1xf32>
    %289 = arith.divf %287, %288 : vector<8x1xf32>
    %290 = vector.broadcast %289 : vector<8x1xf32> to vector<8x32xf32>
    %291 = arith.subf %285, %290 : vector<8x32xf32>
    %292 = arith.mulf %291, %291 : vector<8x32xf32>
    %cst_120 = arith.constant dense<0.000000e+00> : vector<8xf32>
    %293 = vector.multi_reduction <add>, %292, %cst_120 [1] : vector<8x32xf32> to vector<8xf32>
    %294 = vector.shape_cast %293 : vector<8xf32> to vector<8x1xf32>
    %cst_121 = arith.constant 3.200000e+01 : f32
    %295 = vector.broadcast %cst_121 : f32 to vector<8x1xf32>
    %296 = arith.divf %294, %295 : vector<8x1xf32>
    %297 = vector.broadcast %289 : vector<8x1xf32> to vector<8x32xf32>
    %298 = arith.subf %285, %297 : vector<8x32xf32>
    %cst_122 = arith.constant 9.99999996E-13 : f32
    %299 = vector.broadcast %cst_122 : f32 to vector<8x1xf32>
    %300 = arith.addf %296, %299 : vector<8x1xf32>
    %301 = math.rsqrt %300 : vector<8x1xf32>
    %302 = vector.broadcast %301 : vector<8x1xf32> to vector<8x32xf32>
    %303 = arith.mulf %298, %302 : vector<8x32xf32>
    %c19 = arith.constant 19 : index
    %c0_123 = arith.constant 0 : index
    %304 = vector.load %arg10[%c19, %c0_123] : memref<21x128xf32, #tpu.memory_space<vmem>>, vector<1x32xf32>
    %305 = vector.broadcast %304 : vector<1x32xf32> to vector<8x32xf32>
    %306 = arith.mulf %303, %305 : vector<8x32xf32>
    %c20 = arith.constant 20 : index
    %c0_124 = arith.constant 0 : index
    %307 = vector.load %arg10[%c20, %c0_124] : memref<21x128xf32, #tpu.memory_space<vmem>>, vector<1x32xf32>
    %308 = vector.broadcast %307 : vector<1x32xf32> to vector<8x32xf32>
    %309 = arith.addf %306, %308 : vector<8x32xf32>
    %310 = vector.extract_strided_slice %309 {offsets = [0, 0], sizes = [1, 32], strides = [1, 1]} : vector<8x32xf32> to vector<1x32xf32>
    %c2_125 = arith.constant 2 : index
    %c0_126 = arith.constant 0 : index
    %311 = vector.load %arg10[%c2_125, %c0_126] : memref<21x128xf32, #tpu.memory_space<vmem>>, vector<1x32xf32>
    %312 = arith.mulf %310, %311 : vector<1x32xf32>
    %c3_127 = arith.constant 3 : index
    %c0_128 = arith.constant 0 : index
    %313 = vector.load %arg10[%c3_127, %c0_128] : memref<21x128xf32, #tpu.memory_space<vmem>>, vector<1x32xf32>
    %314 = arith.addf %312, %313 : vector<1x32xf32>
    %315 = arith.truncf %314 : vector<1x32xf32> to vector<1x32xbf16>
    %c0_129 = arith.constant 0 : index
    %c0_130 = arith.constant 0 : index
    %316 = vector.load %arg9[%c0_129, %c0_130] : memref<32x128xbf16, #tpu.memory_space<vmem>>, vector<32x128xbf16>
    %cst_131 = arith.constant dense<0.000000e+00> : vector<1x128xf32>
    %317 = tpu.matmul %315, %316, %cst_131 {dimension_numbers = #tpu.dot_dimension_numbers<[1], [0], [0], [1], [0, 0, 1, 1], [], []>} : vector<1x32xbf16>, vector<32x128xbf16>, vector<1x128xf32> -> vector<1x128xf32>
    %c4_132 = arith.constant 4 : index
    %c0_133 = arith.constant 0 : index
    %318 = vector.load %arg10[%c4_132, %c0_133] : memref<21x128xf32, #tpu.memory_space<vmem>>, vector<1x128xf32>
    %319 = arith.addf %317, %318 : vector<1x128xf32>
    %320 = vector.shape_cast %319 : vector<1x128xf32> to vector<1x1x128xf32>
    %c0_134 = arith.constant 0 : index
    %c0_135 = arith.constant 0 : index
    %c0_136 = arith.constant 0 : index
    %321 = vector.load %arg11[%c0_134, %c0_135, %c0_136] : memref<1x1x128xf32, #tpu.memory_space<vmem>>, vector<1x1x128xf32>
    tpu.vector_store %arg11[%c0_134, %c0_135, %c0_136], %320 {strides = array<i32>} : memref<1x1x128xf32, #tpu.memory_space<vmem>>, vector<1x1x128xf32>,
    return
  }
  func.func @transform_0(%arg0: i32, %arg1: memref<16xi32, #tpu.memory_space<smem>>) -> (i32, i32) {
    %c0_i32 = arith.constant 0 : i32
    %c0_i32_0 = arith.constant 0 : i32
    %c0_i32_1 = arith.constant 0 : i32
    return %c0_i32, %c0_i32_0 : i32, i32
  }
  func.func @transform_1(%arg0: i32, %arg1: memref<16xi32, #tpu.memory_space<smem>>) -> (i32, i32) {
    %c0_i32 = arith.constant 0 : i32
    %c0_i32_0 = arith.constant 0 : i32
    %c0_i32_1 = arith.constant 0 : i32
    return %c0_i32, %c0_i32_0 : i32, i32
  }
  func.func @transform_2(%arg0: i32, %arg1: memref<16xi32, #tpu.memory_space<smem>>) -> (i32, i32, i32) {
    %c0_i32 = arith.constant 0 : i32
    %c0_i32_0 = arith.constant 0 : i32
    %c0_i32_1 = arith.constant 0 : i32
    return %arg0, %c0_i32, %c0_i32_0 : i32, i32, i32
  }
  func.func @transform_3(%arg0: i32, %arg1: memref<16xi32, #tpu.memory_space<smem>>) -> (i32, i32, i32) {
    %c0_i32 = arith.constant 0 : i32
    %c0_i32_0 = arith.constant 0 : i32
    %c0_i32_1 = arith.constant 0 : i32
    %c0_i32_2 = arith.constant 0 : i32
    return %c0_i32, %c0_i32_0, %c0_i32_1 : i32, i32, i32
  }
  func.func @transform_4(%arg0: i32, %arg1: memref<16xi32, #tpu.memory_space<smem>>) -> (i32, i32, i32) {
    %c0_i32 = arith.constant 0 : i32
    %c0_i32_0 = arith.constant 0 : i32
    %c0_i32_1 = arith.constant 0 : i32
    %c0_i32_2 = arith.constant 0 : i32
    return %c0_i32, %c0_i32_0, %c0_i32_1 : i32, i32, i32
  }
  func.func @transform_5(%arg0: i32, %arg1: memref<16xi32, #tpu.memory_space<smem>>) -> (i32, i32, i32) {
    %c0_i32 = arith.constant 0 : i32
    %c0_i32_0 = arith.constant 0 : i32
    %c0_i32_1 = arith.constant 0 : i32
    %c0_i32_2 = arith.constant 0 : i32
    return %c0_i32, %c0_i32_0, %c0_i32_1 : i32, i32, i32
  }
  func.func @transform_6(%arg0: i32, %arg1: memref<16xi32, #tpu.memory_space<smem>>) -> (i32, i32, i32) {
    %c0_i32 = arith.constant 0 : i32
    %c0_i32_0 = arith.constant 0 : i32
    %c0_i32_1 = arith.constant 0 : i32
    %c0_i32_2 = arith.constant 0 : i32
    return %c0_i32, %c0_i32_0, %c0_i32_1 : i32, i32, i32
  }
  func.func @transform_7(%arg0: i32, %arg1: memref<16xi32, #tpu.memory_space<smem>>) -> (i32, i32) {
    %c0_i32 = arith.constant 0 : i32
    %c0_i32_0 = arith.constant 0 : i32
    %c0_i32_1 = arith.constant 0 : i32
    return %c0_i32, %c0_i32_0 : i32, i32
  }
  func.func @transform_8(%arg0: i32, %arg1: memref<16xi32, #tpu.memory_space<smem>>) -> (i32, i32) {
    %c0_i32 = arith.constant 0 : i32
    %c0_i32_0 = arith.constant 0 : i32
    %c0_i32_1 = arith.constant 0 : i32
    return %c0_i32, %c0_i32_0 : i32, i32
  }
  func.func @transform_9(%arg0: i32, %arg1: memref<16xi32, #tpu.memory_space<smem>>) -> (i32, i32, i32) {
    %c0_i32 = arith.constant 0 : i32
    %c0_i32_0 = arith.constant 0 : i32
    %c0_i32_1 = arith.constant 0 : i32
    return %arg0, %c0_i32, %c0_i32_0 : i32, i32, i32
  }
}

</mosaic_0001>

<bundles_post_ra>
// kernel: transformer_text_classifier.1
= control target key start
LH: loop header
LB: loop body
LE: loop exit
PB: predicated region body
PF: predicated region fallthrough
CT: control target
= control target key end

     0   :  { %s4877_s0 = inlined_call_operand.vmem [shape: s32[16], index: 0, kind: input, shape index: {}]   ;;  %s4878_s1 = inlined_call_operand.vmem [shape: f32[100,32], index: 1, kind: input, shape index: {}]   ;;  %s4879_s2 = inlined_call_operand.vmem [shape: f32[8,32], index: 2, kind: input, shape index: {}]   ;;  %s4880_s3 = inlined_call_operand.vmem [shape: f32[2,1,8], index: 3, kind: input, shape index: {}]   ;;  %s4881_s4 = inlined_call_operand.vmem [shape: bf16[2,32,96], index: 4, kind: input, shape index: {}]   ;;  %s4882_s5 = inlined_call_operand.vmem [shape: bf16[2,32,32], index: 5, kind: input, shape index: {}]   ;;  %s4883_s6 = inlined_call_operand.vmem [shape: bf16[2,32,128], index: 6, kind: input, shape index: {}]   ;;  %s4884_s7 = inlined_call_operand.vmem [shape: bf16[2,128,32], index: 7, kind: input, shape index: {}]   ;;  %s4885_s8 = inlined_call_operand.vmem [shape: bf16[32,128], index: 8, kind: input, shape index: {}]   ;;  %s4886_s9 = inlined_call_operand.vmem [shape: f32[21,128], index: 9, kind: input, shape index: {}]   ;;  %s4887_s10 = inlined_call_operand.hbm [shape: f32[2,1,128], index: 10, kind: output, shape index: {}]  }
   0x1   :  { %4897 = sst [smem:[#allocation16_spill]] %s4887_s10  ;;  %s15_s15 = sshll.u32 %s4877_s0, 4  ;;  %s16_s15 = int_to_ptr.vmem [resolvable:$true] %s15_s15 }
   0x2   :  { %s4187_s16 = scalar_lea.vmem %s16_s15, 16  ;;  %p4192_p1 = scmp.lt.s32.totalorder %s16_s15, %s16_s15 }
   0x3   :  { %p4188_p0 = scmp.ne.s32.totalorder %s16_s15, %s4187_s16  ;;  %p4193_p2 = scmp.lt.s32.totalorder %s4187_s16, %s4187_s16 }
   0x5   :  { %p4194_p3 = por %p4193_p2, %p4192_p1 }
   0x7   :  { %p4195_p4 = pnand %p4194_p3, %p4188_p0 }
   0x9   :  { %4198 = shalt.err (!%p4195_p4)  }
   0xa   :  { %s4265_s17 = smov [#allocation4]  }
   0xb   :  { %18 = dma.vmem_to_smem %s16_s15, 16, %s4265_s17, [#allocation3] }
   0xc   :  { %4243 = dma.done.wait [#allocation3], 16 }
   0xd   :  { %4244 = vsyncadd [#allocation3], 4294967280 }
   0xe   :  { %20 = sfence }
   0xf   :  { %21 = vsyncpa [#allocation6], 0 }
  0x10   :  { %23 = vsyncpa [#allocation6 + $0x1], 0  ;;  %s4337_s18 = smov 0   ;;  %s4339_s19 = smov 0  }
  0x11   :  { %s4341_s0 = smov 0   ;;  %s4343_s20 = smov 0  }
  0x12 LB: > { %4898 = sst [smem:[#allocation9_spill]] %s4251_s18  ;;  %s4358_s21 = sadd.s32 4294967295, %s4263_s20   ;;  %s4263_s20 = sphi %s4343_s20, %s4912_s20   ;;  %s4259_s0 = sphi %s4341_s0, %s4914_s0   ;;  %s4255_s19 = sphi %s4339_s19, %s4916_s19   ;;  %s4251_s18 = sphi %s4337_s18, %s4915_s18  }
  0x13   : > { %4899 = sst [smem:[#allocation10_spill]] %s4259_s0  ;;  %s3692_s22 = sadd.s32 4294967294, %s4263_s20  }
  0x14   : > { %4900 = sst [smem:[#allocation11_spill]] %s4263_s20  ;;  %s4362_s23 = sadd.s32 1, %s4263_s20  }
  0x15   : > { %4901 = sst [smem:[#allocation12_spill]] %s4362_s23  ;;  %s230_s24 = sadd.s32 1, %s4259_s0 }
  0x16   : > { %s227_s25 = ssub.s32 %s4263_s20, %s4362_s23  ;;  %p240_p5 = scmp.ne.s32.totalorder %s4259_s0, %s4255_s19 }
  0x17   : > { %p228_p6 = scmp.eq.s32.totalorder %s227_s25, 0  ;;  %p241_p7 = scmp.eq.s32.totalorder %s4358_s21, 1 }
  0x18   : > { %p246_p8 = scmp.ne.s32.totalorder %s4255_s19, %s4251_s18  ;;  %p247_p9 = scmp.eq.s32.totalorder %s3692_s22, 1 }
  0x19   : > { %s4373_s26 = scalar_select %p228_p6, %s4259_s0, %s230_s24  }
  0x1a   : > { %p4375_p10 = por %p241_p7, %p240_p5  ;;  %p4379_p11 = por %p247_p9, %p246_p8 }
  0x1b   : > { %4902 = sst [smem:[#allocation13_spill]] %s4373_s26  ;;  %p3695_p12 = scmp.ge.s32.totalorder %s4263_s20, 1 }
  0x1c   : > { %s4903_s27 = scalar_select %p4375_p10, 1, 0 }
  0x1d   : > { %s4905_s28 = scalar_select %p4379_p11, 1, 0 }
  0x1e   : > { %4904 = sst [smem:[#allocation14_spill]] %s4903_s27  ;;  %p295_p13 = scmp.lt.s32.totalorder %s4263_s20, 3 }
  0x1f   : > { %4906 = sst [smem:[#allocation15_spill]] %s4905_s28 }
  0x20   : > { %p296_p0 = pnand %p3695_p12, %p295_p13 }
  0x21   : > { %s3696_s29 = sshll.u32 (!%p296_p0), %s4358_s21, 3  ;;  %vm336_vm0 = vcmask (!%p296_p0), 253952   ;;  %v374_v8 = vld [vmem:[%s4879_s2] sm:$0xff] (!%p296_p0)  ;;  %vm376_vm1 = vcmask (!%p296_p0), 261120   ;;  %v4266_v18 = vmov (!%p296_p0), 0.0   ;;  %v4112_v19 = vld [vmem:[%s4881_s4 + $0x8] sm:$0xff] (!%p296_p0)  }
  0x22   : > { %299 = sbr.rel (%p296_p0) target bundleno = 6455 (0x1937), region = 56  ;;  %s333_s30 = sld [smem:[#allocation4 + %s3696_s29]] (!%p296_p0)  ;;  %v4111_v17 = vld [vmem:[%s4881_s4] sm:$0xff] (!%p296_p0)   ;;  %3883 = vmatprep.subr.bf16.mxu1 (!%p296_p0), %v4266_v18  ;;  %3891 = vmatprep.subr.mxu0 (!%p296_p0), %v4266_v18  ;;  %vm4267_vm2 = vmmov (!%p296_p0), 0   ;;  %vm622_vm3 = vcmask (!%p296_p0), 64512   ;;  %vm1676_vm4 = vcmask (!%p296_p0), 130048  }
  0x23   : > { %s338_s11 = sadd.s32 (!%p296_p0), 1, %s3696_s29  ;;  %s343_s13 = sadd.s32 (!%p296_p0), 2, %s3696_s29  ;;  %3884 = vmatpush3.bf16.msra.mxu1 (!%p296_p0), %v4111_v17  ;;  %3887 = vmatprep.mubr.msk.bf16.mxu1 (!%p296_p0), %vm4267_vm2, %v4266_v18  ;;  %v3697_v24 = vld [vmem:[%s4886_s9] ss:$0 sm:$0xff] (!%p296_p0)  ;;  %v3698_v26 = vld [vmem:[%s4886_s9 + $0x1] ss:$0 sm:$0xff] (!%p296_p0) }
  0x24   : > { %s339_s12 = sld [smem:[#allocation4 + %s338_s11]] (!%p296_p0)  ;;  %s348_s15 = sadd.s32 (!%p296_p0), 3, %s3696_s29  ;;  %3885 = vmatprep.subr.bf16.mxu1 (!%p296_p0), %v4266_v18  ;;  %3893 = vmatprep.mubr.msk.f32.mxu0 (!%p296_p0), %vm4267_vm2, %v4266_v18  ;;  %v3699_v30 = vld [vmem:[%s4886_s9 + $0x5] ss:$0 sm:$0xff] (!%p296_p0)  ;;  %vm1678_vm5 = vcmask (!%p296_p0), 195584  }
  0x25   : > { %s344_s14 = sld [smem:[#allocation4 + %s343_s13]] (!%p296_p0)  ;;  %s353_s17 = sadd.s32 (!%p296_p0), 4, %s3696_s29 }
  0x26   : > { %s349_s16 = sld [smem:[#allocation4 + %s348_s15]] (!%p296_p0)  ;;  %s358_s24 = sadd.s32 (!%p296_p0), 5, %s3696_s29 }
  0x27   : > { %s354_s22 = sld [smem:[#allocation4 + %s353_s17]] (!%p296_p0)  ;;  %s363_s26 = sadd.s32 (!%p296_p0), 6, %s3696_s29  ;;  %3886 = vmatpush3.bf16.msra.mxu1 (!%p296_p0), %v4112_v19 }
  0x28   : > { %s359_s25 = sld [smem:[#allocation4 + %s358_s24]] (!%p296_p0)  ;;  %s334_s28 = scalar_lea.vmem (!%p296_p0), %s4878_s1, %s333_s30  ;;  %3896 = vmatprep.subr.mxu1 (!%p296_p0), %v4266_v18 }
  0x29   : > { %s364_s18 = sld [smem:[#allocation4 + %s363_s26]]  ;;  %v335_v0 = vld [vmem:[%s334_s28] sm:$0x1]  ;;  %s368_s11 = sadd.s32 7, %s3696_s29 }
  0x2a   : > { %s340_s27 = scalar_lea.vmem %s4878_s1, %s339_s12  ;;  %337 = vst.msk [vmem:[#allocation2] sm:$0x1] %vm336_vm0, %v335_v0  ;;  %s369_s24 = sld [smem:[#allocation4 + %s368_s11]] }
  0x2b   : > { %v341_v1 = vld [vmem:[%s340_s27] sm:$0x1]  ;;  %s345_s17 = scalar_lea.vmem %s4878_s1, %s344_s14  ;;  %s4268_s29 = smov 104  }
  0x2c   : > { %342 = vst.msk [vmem:[#allocation2 + $0x1] sm:$0x1] %vm336_vm0, %v341_v1  ;;  %v346_v2 = vld [vmem:[%s345_s17] sm:$0x1]  ;;  %s350_s26 = scalar_lea.vmem %s4878_s1, %s349_s16  ;;  %s4270_s12 = smov 112  }
  0x2d   : > { %347 = vst.msk [vmem:[#allocation2 + $0x2] sm:$0x1] %vm336_vm0, %v346_v2  ;;  %v351_v3 = vld [vmem:[%s350_s26] sm:$0x1]  ;;  %s355_s28 = scalar_lea.vmem %s4878_s1, %s354_s22  ;;  %s4271_s14 = smov 96  }
  0x2e   : > { %352 = vst.msk [vmem:[#allocation2 + $0x3] sm:$0x1] %vm336_vm0, %v351_v3  ;;  %v356_v4 = vld [vmem:[%s355_s28] sm:$0x1]  ;;  %s360_s30 = scalar_lea.vmem %s4878_s1, %s359_s25  ;;  %p328_p1 = scmp.lt.s32.totalorder %s4358_s21, 1 }
  0x2f   : > { %357 = vst.msk [vmem:[#allocation2 + $0x4] sm:$0x1] %vm336_vm0, %v356_v4  ;;  %v361_v5 = vld [vmem:[%s360_s30] sm:$0x1]  ;;  %s365_s16 = scalar_lea.vmem %s4878_s1, %s364_s18  ;;  %s4269_s30 = smov 120  }
  0x30   : > { %362 = vst.msk [vmem:[#allocation2 + $0x5] sm:$0x1] %vm336_vm0, %v361_v5  ;;  %v366_v6 = vld [vmem:[%s365_s16] sm:$0x1]  ;;  %s370_s13 = scalar_lea.vmem %s4878_s1, %s369_s24  ;;  %s4272_s25 = smov 64  }
  0x31   : > { %367 = vst.msk [vmem:[#allocation2 + $0x6] sm:$0x1] %vm336_vm0, %v366_v6  ;;  %v371_v7 = vld [vmem:[%s370_s13] sm:$0x1]  ;;  %s329_s16 = scalar_select %p328_p1, %s4358_s21, 1 }
  0x32   : > { %372 = vst.msk [vmem:[#allocation2 + $0x7] sm:$0x1] %vm336_vm0, %v371_v7  ;;  %s4275_s0 = smov 16   ;;  %s4276_s23 = smov 8  }
  0x33   : > { %s330_s13 = scalar_lea.vmem %s4880_s3, %s329_s16  ;;  %s4277_s26 = smov 24  }
  0x34   : > { %v4488_v47 = vld [vmem:[%s330_s13] ss:$0 sm:$0xff]  ;;  %s3809_s11 = sshll.u32 %s4358_s21, 4  ;;  %s4908_s24 = sld [smem:[#allocation16_spill]] }
  0x35   : > { %s4278_s28 = smov [#allocation5]  }
  0x36   : > { %s4203_s27 = sshll.u32 %s4278_s28, 4  ;;  %s4204_s27 = int_to_ptr.vmem [resolvable:$false] %s4203_s27 }
  0x39   : > { %v373_v9 = vld [vmem:[#allocation2] sm:$0xff] }
  0x3a   : > { %v375_v10 = vadd.f32 %v374_v8, %v373_v9  ;;  %s4835_s10 = scalar_lea.hbm %s4908_s24, %s3809_s11 }
  0x3c   : > { %v377_v11 = vsel %vm376_vm1, %v375_v10, 0.0 }
  0x3d   : > { %378 = vadd.xlane.f32.xlu0 %v377_v11 }
  0xca   : > { %v379_v12 = vpop.xlane.xlu0 %378 }
  0xcb   : > { %v381_v13 = vmul.f32 0.03125, %v379_v12 }
  0xcd   : > { %v382_v14 = vsub.f32 %v375_v10, %v381_v13 }
  0xcf   : > { %v383_v15 = vmul.f32 %v382_v14, %v382_v14 }
  0xd1   : > { %v384_v16 = vsel %vm376_vm1, %v383_v15, 0.0 }
  0xd2   : > { %385 = vadd.xlane.f32.xlu0 %v384_v16 }
 0x15f   : > { %v386_v20 = vpop.xlane.xlu0 %385 }
 0x160   : > { %v387_v21 = vmul.f32 0.03125, %v386_v20 }
 0x162   : > { %v388_v22 = vadd.f32 1e-12, %v387_v21 }
 0x164   : > { %4141 = vrsqrt.f32 %v388_v22 }
 0x16e   : > { %v4142_v23 = vpop.eup %4141 }
 0x16f   : > { %v390_v25 = vmul.f32 %v4142_v23, %v382_v14 }
 0x171   : > { %v396_v27 = vmul.f32 %v3697_v24, %v390_v25 }
 0x173   : > { %v4443_v28 = vadd.f32 %v3698_v26, %v396_v27 }
 0x175   : > { %v404_v29 = vpack.c.bf16 %v4443_v28, %v4443_v28 }
 0x177   : > { %3888 = vmatmul.mubr.msk.bf16.vlgmr.msra.gmra.mrb[0].mxu1 %vm376_vm1, %v404_v29 }
 0x178   : > { %3898 = vmatprep.mubr.msk.f32.mxu1 %vm4267_vm2, %v4266_v18 }
 0x24a   : > { %v463_v31 = vpop.f32.mrb[0].mxu1 }
 0x24b   : > { %v4453_v32 = vadd.f32 %v3699_v30, %v463_v31  ;;  %v3889_v33 = vpop.f32.mrb[1].mxu1 }
 0x24c   : > { %v466_v34 = vpop.f32.mrb[2].mxu1 }
 0x24d   : > { %474 = vrot.lane.b32.xlu0 %v4453_v32, %s4268_s29  ;;  %470 = vrot.lane.b32.xlu1 %v4453_v32, %s4269_s30  ;;  %v3890_v35 = vpop.f32.mrb[3].mxu1 }
 0x251   : > { %472 = vrot.lane.b32.xlu1 %v4453_v32, %s4270_s12 }
 0x255   : > { %482 = vrot.lane.b32.xlu1 %v4453_v32, %s4271_s14 }
 0x2bf   : > { %v471_v36 = vpop.permute.xlu1 %470  ;;  %v475_v38 = vpop.permute.xlu0 %474 }
 0x2c0   : > { %484 = vrot.lane.b32.xlu1 %v471_v36, %s4271_s14 }
 0x2c3   : > { %v473_v37 = vpop.permute.xlu1 %472 }
 0x2c4   : > { %486 = vrot.lane.b32.xlu1 %v473_v37, %s4271_s14 }
 0x2c7   : > { %v483_v39 = vpop.permute.xlu1 %482 }
 0x2c8   : > { %488 = vrot.lane.b32.xlu1 %v475_v38, %s4271_s14  ;;  %494 = vxpose.xlu0.b32.start.end [1/1] (short) (narrow) %v483_v39, 8 }
 0x332   : > { %v485_v40 = vpop.permute.xlu1 %484 }
 0x333   : > { %526 = vxpose.xlu1.b32.start.end [1/1] (short) (narrow) %v485_v40, 8 }
 0x336   : > { %v487_v41 = vpop.permute.xlu1 %486 }
 0x337   : > { %558 = vxpose.xlu0.b32.start.end [1/1] (short) (narrow) %v487_v41, 8 }
 0x33a   : > { %v489_v42 = vpop.permute.xlu1 %488 }
 0x33b   : > { %590 = vxpose.xlu0.b32.start.end [1/1] (short) (narrow) %v489_v42, 8 }
 0x348   : > { %v510_v43 = vpop.trf.xlu0 }
 0x349   : > { %3892 = vmatpush3.msra.mxu0 %v510_v43 }
 0x34a   : > { %3894 = vmatmul.mubr.msk.f32.vlgmr.msra.gmra.mrb[0].mxu0 %vm622_vm3, %v4453_v32  ;;  %3911 = vmatprep.subr.mxu0 %v4266_v18 }
 0x34b   : > { %3913 = vmatprep.mubr.msk.f32.mxu0 %vm4267_vm2, %v4266_v18 }
 0x3b3   : > { %v542_v44 = vpop.trf.xlu1 }
 0x3b4   : > { %3897 = vmatpush3.msra.mxu1 %v542_v44 }
 0x3b5   : > { %3899 = vmatmul.mubr.msk.f32.vlgmr.msra.gmra.mrb[4].mxu1 %vm622_vm3, %v471_v36  ;;  %3901 = vmatprep.subr.mxu1 %v4266_v18 }
 0x3b6   : > { %3903 = vmatprep.mubr.msk.f32.mxu1 %vm4267_vm2, %v4266_v18 }
 0x3b7   : > { %v574_v45 = vpop.trf.xlu0 }
 0x3b8   : > { %3902 = vmatpush3.msra.mxu1 %v574_v45 }
 0x3b9   : > { %3904 = vmatmul.mubr.msk.f32.vlgmr.msra.gmra.mrb[6].mxu1 %vm622_vm3, %v473_v37  ;;  %3906 = vmatprep.subr.mxu1 %v4266_v18 }
 0x3ba   : > { %3908 = vmatprep.mubr.msk.f32.mxu1 %vm4267_vm2, %v4266_v18 }
 0x3bb   : > { %v606_v46 = vpop.trf.xlu0 }
 0x3bc   : > { %3907 = vmatpush3.msra.mxu1 %v606_v46 }
 0x3bd   : > { %3909 = vmatmul.mubr.msk.f32.vlgmr.msra.gmra.mrb[8].mxu1 %vm622_vm3, %v475_v38  ;;  %3916 = vmatprep.subr.mxu1 %v4266_v18 }
 0x3be   : > { %3918 = vmatprep.mubr.msk.f32.mxu1 %vm4267_vm2, %v4266_v18 }
 0x41d   : > { %v691_v48 = vpop.f32.mrb[0].mxu0 }
 0x41e   : > { %v692_v49 = vadd.f32 %v4488_v47, %v691_v48  ;;  %v3895_v50 = vpop.f32.mrb[1].mxu0 }
 0x420   : > { %v911_v51 = vsel %vm622_vm3, %v692_v49, -inf }
 0x421   : > { %912 = vmax.xlane.f32.xlu1 %v911_v51 }
 0x488   : > { %v763_v52 = vpop.f32.mrb[4].mxu1 }
 0x489   : > { %v764_v53 = vadd.f32 %v4488_v47, %v763_v52  ;;  %v3900_v54 = vpop.f32.mrb[5].mxu1  ;;  %v4273_v52 = vmov 1983009808  }
 0x48a   : > { %v1532_v54 = vlaneseq }
 0x48b   : > { %v914_v55 = vsel %vm622_vm3, %v764_v53, -inf }
 0x48c   : > { %v835_v56 = vpop.f32.mrb[6].mxu1  ;;  %915 = vmax.xlane.f32.xlu0 %v914_v55 }
 0x48d   : > { %v836_v57 = vadd.f32 %v4488_v47, %v835_v56  ;;  %v3905_v58 = vpop.f32.mrb[7].mxu1  ;;  %v4274_v56 = vmov 1934713408  }
 0x48f   : > { %v917_v59 = vsel %vm622_vm3, %v836_v57, -inf }
 0x490   : > { %v907_v60 = vpop.f32.mrb[8].mxu1  ;;  %918 = vmax.xlane.f32.xlu1 %v917_v59  ;;  %v1533_v59 = vshrl.u32 %v1532_v54, 7 }
 0x491   : > { %v908_v61 = vadd.f32 %v4488_v47, %v907_v60  ;;  %v3910_v62 = vpop.f32.mrb[9].mxu1 }
 0x493   : > { %v920_v63 = vsel %vm622_vm3, %v908_v61, -inf }
 0x494   : > { %921 = vmax.xlane.f32.xlu1 %v920_v63 }
 0x4a2   : > { %957 = vrot.lane.b32.xlu0 %v471_v36, %s4272_s25 }
 0x4a5   : > { %955 = vrot.lane.b32.xlu1 %v4453_v32, %s4272_s25 }
 0x4a9   : > { %959 = vrot.lane.b32.xlu1 %v473_v37, %s4272_s25 }
 0x4ad   : > { %961 = vrot.lane.b32.xlu1 %v475_v38, %s4272_s25 }
 0x4ae   : > { %v913_v0 = vpop.xlane.xlu1 %912 }
 0x4af   : > { %v923_v1 = vsub.f32 %v692_v49, %v913_v0 }
 0x4b1   : > { %v927_v2 = vmul.f32 1.442695, %v923_v1 }
 0x4b3   : > { %4143 = vpow2.f32 %v927_v2 }
 0x4bd   : > { %v4144_v3 = vpop.eup %4143 }
 0x4be   : > { %v935_v4 = vsel %vm622_vm3, %v4144_v3, 0.0 }
 0x4c1   : > { %936 = vadd.xlane.f32.xlu0 %v935_v4 }
 0x519   : > { %v916_v5 = vpop.xlane.xlu0 %915 }
 0x51a   : > { %v924_v6 = vsub.f32 %v764_v53, %v916_v5  ;;  %v1530_v53 = vunpack.c.l.s4 %v4273_v52 }
 0x51c   : > { %v929_v7 = vmul.f32 1.442695, %v924_v6  ;;  %v1531_v58 = vunpack.c.0.s8 %v1530_v53 }
 0x51d   : > { %v919_v8 = vpop.xlane.xlu1 %918  ;;  %v958_v21 = vpop.permute.xlu0 %957 }
 0x51e   : > { %4145 = vpow2.f32 %v929_v7  ;;  %v925_v9 = vsub.f32 %v836_v57, %v919_v8  ;;  %v1562_v57 = vunpack.c.l.s4 %v4274_v56  ;;  %v4527_v62 = vsub.s32 %v1531_v58, %v1533_v59 }
 0x520   : > { %v931_v10 = vmul.f32 1.442695, %v925_v9 }
 0x521   : > { %v922_v11 = vpop.xlane.xlu1 %921 }
 0x522   : > { %4147 = vpow2.f32 %v931_v10  ;;  %v926_v12 = vsub.f32 %v908_v61, %v922_v11  ;;  %v1563_v61 = vunpack.c.0.s8 %v1562_v57 }
 0x524   : > { %v933_v13 = vmul.f32 1.442695, %v926_v12  ;;  %v4529_v4 = vsub.s32 %v1563_v61, %v1533_v59 }
 0x525   : > { %v956_v24 = vpop.permute.xlu1 %955 }
 0x526   : > { %4149 = vpow2.f32 %v933_v13  ;;  %v4113_v13 = vld [vmem:[%s4882_s5] sm:$0xff]  }
 0x528   : > { %v4146_v14 = vpop.eup %4145 }
 0x529   : > { %v938_v15 = vsel %vm622_vm3, %v4146_v14, 0.0  ;;  %v960_v26 = vpop.permute.xlu1 %959 }
 0x52a   : > { %939 = vadd.xlane.f32.xlu1 %v938_v15 }
 0x52c   : > { %v4148_v16 = vpop.eup %4147 }
 0x52d   : > { %v941_v17 = vsel %vm622_vm3, %v4148_v16, 0.0  ;;  %v962_v27 = vpop.permute.xlu1 %961 }
 0x52e   : > { %942 = vadd.xlane.f32.xlu0 %v941_v17 }
 0x530   : > { %v4150_v19 = vpop.eup %4149 }
 0x531   : > { %v944_v20 = vsel %vm622_vm3, %v4150_v19, 0.0 }
 0x532   : > { %945 = vadd.xlane.f32.xlu0 %v944_v20 }
 0x54e   : > { %v937_v22 = vpop.xlane.xlu0 %936 }
 0x54f   : > { %4151 = vrcp.f32 %v937_v22 }
 0x559   : > { %v4152_v23 = vpop.eup %4151 }
 0x55a   : > { %v951_v25 = vmul.f32 %v4152_v23, %v4144_v3  ;;  %v4114_v23 = vld [vmem:[%s4882_s5 + $0x8] sm:$0xff]  }
 0x55c   : > { %3912 = vmatpush3.xpose.msk.msra.mxu0 %vm622_vm3, %v951_v25 }
 0x55d   : > { %967 = vxpose.xlu1.b32.start.end [1/1] (short) (narrow) %v956_v24, 8  ;;  %3921 = vmatprep.subr.mxu0 %v4266_v18 }
 0x55f   : > { %999 = vxpose.xlu0.b32.start.end [1/1] (short) (narrow) %v958_v21, 8 }
 0x563   : > { %1031 = vxpose.xlu0.b32.start.end [1/1] (short) (narrow) %v960_v26, 8 }
 0x567   : > { %1063 = vxpose.xlu0.b32.start.end [1/1] (short) (narrow) %v962_v27, 8 }
 0x5b7   : > { %v940_v29 = vpop.xlane.xlu1 %939 }
 0x5b8   : > { %4153 = vrcp.f32 %v940_v29 }
 0x5bb   : > { %v943_v32 = vpop.xlane.xlu0 %942 }
 0x5bc   : > { %4155 = vrcp.f32 %v943_v32 }
 0x5bf   : > { %v946_v33 = vpop.xlane.xlu0 %945 }
 0x5c0   : > { %4157 = vrcp.f32 %v946_v33 }
 0x5c2   : > { %v4154_v30 = vpop.eup %4153 }
 0x5c3   : > { %v952_v31 = vmul.f32 %v4154_v30, %v4146_v14 }
 0x5c5   : > { %3917 = vmatpush3.xpose.msk.msra.mxu1 %vm622_vm3, %v952_v31 }
 0x5c6   : > { %3926 = vmatprep.subr.mxu1 %v4266_v18  ;;  %v4156_v34 = vpop.eup %4155 }
 0x5c7   : > { %v953_v36 = vmul.f32 %v4156_v34, %v4148_v16 }
 0x5ca   : > { %v4158_v35 = vpop.eup %4157 }
 0x5cb   : > { %v954_v38 = vmul.f32 %v4158_v35, %v4150_v19 }
 0x5dd   : > { %v983_v37 = vpop.trf.xlu1 }
 0x5de   : > { %3914 = vmatmul.mubr.msk.f32.vlgmr.msra.gmra.mrb[2].mxu0 %vm622_vm3, %v983_v37 }
 0x5df   : > { %3922 = vmatpush3.xpose.msk.msra.mxu0 %vm622_vm3, %v953_v36  ;;  %v1015_v39 = vpop.trf.xlu0  ;;  %3923 = vmatprep.mubr.msk.f32.mxu0 %vm4267_vm2, %v4266_v18 }
 0x5e0   : > { %3919 = vmatmul.mubr.msk.f32.vlgmr.msra.gmra.mrb[10].mxu1 %vm622_vm3, %v1015_v39  ;;  %3931 = vmatprep.subr.bf16.mxu0 %v4266_v18 }
 0x5e1   : > { %3927 = vmatpush3.xpose.msk.msra.mxu1 %vm622_vm3, %v954_v38  ;;  %3928 = vmatprep.mubr.msk.f32.mxu1 %vm4267_vm2, %v4266_v18 }
 0x5e2   : > { %3939 = vmatprep.subr.bf16.mxu1 %v4266_v18 }
 0x5e3   : > { %v1047_v40 = vpop.trf.xlu0 }
 0x5e4   : > { %3924 = vmatmul.mubr.msk.f32.vlgmr.msra.gmra.mrb[4].mxu0 %vm622_vm3, %v1047_v40 }
 0x5e5   : > { %3935 = vmatprep.mubr.msk.bf16.mxu0 %vm4267_vm2, %v4266_v18  ;;  %3932 = vmatpush3.bf16.msra.mxu0 %v4113_v13  ;;  %v4119_v13 = vld [vmem:[%s4884_s7 + $0x10] sm:$0xff]  }
 0x5e6   : > { %3933 = vmatprep.subr.bf16.mxu0 %v4266_v18 }
 0x5e7   : > { %v1079_v41 = vpop.trf.xlu0 }
 0x5e8   : > { %3929 = vmatmul.mubr.msk.f32.vlgmr.msra.gmra.mrb[12].mxu1 %vm622_vm3, %v1079_v41 }
 0x5e9   : > { %3943 = vmatprep.mubr.msk.bf16.mxu1 %vm4267_vm2, %v4266_v18  ;;  %3934 = vmatpush3.bf16.msra.mxu0 %v4114_v23 }
 0x5ea   : > { %3947 = vmatprep.subr.bf16.mxu0 %v4266_v18 }
 0x6b1   : > { %v1167_v42 = vpop.f32.mrb[2].mxu0 }
 0x6b2   : > { %1399 = vxpose.xlu1.b32.start.end [1/1] (short) (narrow) %v1167_v42, 8  ;;  %v3915_v43 = vpop.f32.mrb[3].mxu0 }
 0x6b3   : > { %v1243_v44 = vpop.f32.mrb[10].mxu1 }
 0x6b4   : > { %v3920_v45 = vpop.f32.mrb[11].mxu1  ;;  %1431 = vxpose.xlu0.b32.start.end [1/1] (short) (narrow) %v1243_v44, 8 }
 0x6b7   : > { %v1319_v46 = vpop.f32.mrb[4].mxu0 }
 0x6b8   : > { %v3925_v48 = vpop.f32.mrb[5].mxu0  ;;  %1463 = vxpose.xlu1.b32.start.end [1/1] (short) (narrow) %v1319_v46, 8 }
 0x6bb   : > { %v1395_v49 = vpop.f32.mrb[12].mxu1 }
 0x6bc   : > { %1495 = vxpose.xlu0.b32.start.end [1/1] (short) (narrow) %v1395_v49, 8  ;;  %v3930_v50 = vpop.f32.mrb[13].mxu1  ;;  %v3718_v49 = vld [vmem:[%s4886_s9 + $0x6] ss:$0 sm:$0xff] }
 0x732   : > { %v1415_v51 = vpop.trf.xlu1 }
 0x734   : > { %v1447_v55 = vpop.trf.xlu0 }
 0x738   : > { %v1479_v60 = vpop.trf.xlu1 }
 0x739   : > { %v1527_v63 = vcombine.low %v1415_v51, %v1479_v60  ;;  %v1528_v0 = vcombine.high %v1415_v51, %v1479_v60 }
 0x73b   : > { %v1535_v7 = vrot.slane %v1527_v63, %v4527_v62  ;;  %v1542_v8 = vrot.slane %v1528_v0, %v4527_v62  ;;  %v4115_v63 = vld [vmem:[%s4883_s6] sm:$0xff]   ;;  %v4116_v0 = vld [vmem:[%s4883_s6 + $0x8] sm:$0xff]  }
 0x73c   : > { %v1511_v1 = vpop.trf.xlu0  ;;  %3940 = vmatpush3.bf16.msra.mxu1 %v4115_v63 }
 0x73d   : > { %v1543_v2 = vcombine.low %v1447_v55, %v1511_v1  ;;  %v1544_v3 = vcombine.high %v1447_v55, %v1511_v1  ;;  %3941 = vmatprep.subr.bf16.mxu1 %v4266_v18 }
 0x73f   : > { %v1551_v5 = vrot.slane %v1543_v2, %v4527_v62  ;;  %v1558_v6 = vrot.slane %v1544_v3, %v4527_v62 }
 0x740   : > { %3942 = vmatpush3.bf16.msra.mxu1 %v4116_v0  ;;  %v3743_v0 = vld [vmem:[%s4886_s9 + $0xd] ss:$0 sm:$0xff] }
 0x741   : > { %v1559_v9 = vcombine.low %v1535_v7, %v1551_v5  ;;  %v1560_v10 = vcombine.high %v1535_v7, %v1551_v5  ;;  %v1575_v11 = vcombine.low %v1542_v8, %v1558_v6  ;;  %v1576_v12 = vcombine.high %v1542_v8, %v1558_v6  ;;  %3967 = vmatprep.subr.bf16.mxu1 %v4266_v18  ;;  %v3722_v6 = vld [vmem:[%s4886_s9 + $0x7] ss:$0 sm:$0xff]  ;;  %v3723_v8 = vld [vmem:[%s4886_s9 + $0x8] ss:$0 sm:$0xff] }
 0x743   : > { %v1567_v14 = vrot.slane %v1559_v9, %v4529_v4  ;;  %v1574_v15 = vrot.slane %v1560_v10, %v4529_v4  ;;  %v1583_v16 = vrot.slane %v1575_v11, %v4529_v4  ;;  %v1590_v17 = vrot.slane %v1576_v12, %v4529_v4  ;;  %v4118_v12 = vld [vmem:[%s4884_s7 + $0x8] sm:$0xff]  }
 0x745   : > { %v1595_v19 = vcombine.low %v1567_v14, %v1574_v15  ;;  %v3716_v20 = vcombine.high %v1567_v14, %v1574_v15  ;;  %v1611_v21 = vcombine.low %v1583_v16, %v1590_v17  ;;  %v3717_v22 = vcombine.high %v1583_v16, %v1590_v17  ;;  %v4120_v14 = vld [vmem:[%s4884_s7 + $0x18] sm:$0xff]   ;;  %v4121_v15 = vld [vmem:[%s4884_s7 + $0x20] sm:$0xff]   ;;  %v4122_v16 = vld [vmem:[%s4884_s7 + $0x28] sm:$0xff]  }
 0x746   : > { %v4123_v17 = vld [vmem:[%s4884_s7 + $0x30] sm:$0xff]  }
 0x747   : > { %v1602_v24 = vrot.slane %v1595_v19, %v4527_v62  ;;  %v1610_v25 = vrot.slane %v3716_v20, %v4527_v62  ;;  %v1618_v26 = vrot.slane %v1611_v21, %v4527_v62  ;;  %v1626_v27 = vrot.slane %v3717_v22, %v4527_v62  ;;  %v4124_v19 = vld [vmem:[%s4884_s7 + $0x38] sm:$0xff]   ;;  %v3724_v20 = vld [vmem:[%s4886_s9 + $0x9] ss:$0 sm:$0xff] }
 0x749   : > { %v1628_v29 = vcombine.high %v1602_v24, %v1610_v25  ;;  %v1644_v30 = vcombine.high %v1618_v26, %v1626_v27  ;;  %v1627_v31 = vcombine.low %v1602_v24, %v1610_v25  ;;  %v1643_v32 = vcombine.low %v1618_v26, %v1626_v27 }
 0x74b   : > { %v1642_v33 = vrot.slane %v1628_v29, %v4529_v4  ;;  %v1658_v34 = vrot.slane %v1644_v30, %v4529_v4  ;;  %v1635_v35 = vrot.slane %v1627_v31, %v4529_v4  ;;  %v1651_v36 = vrot.slane %v1643_v32, %v4529_v4 }
 0x74d   : > { %v1661_v37 = vcombine.low %v1642_v33, %v1658_v34  ;;  %v1660_v38 = vcombine.high %v1635_v35, %v1651_v36  ;;  %v1659_v39 = vcombine.low %v1635_v35, %v1651_v36  ;;  %v1662_v40 = vcombine.high %v1642_v33, %v1658_v34 }
 0x74f   : > { %1668 = vrot.lane.b32.xlu0 %v1661_v37, %s4275_s0  ;;  %1664 = vrot.lane.b32.xlu1 %v1660_v38, %s4276_s23  ;;  %v3728_v37 = vld [vmem:[%s4886_s9 + $0xa] ss:$0 sm:$0xff] }
 0x753   : > { %1672 = vrot.lane.b32.xlu1 %v1662_v40, %s4277_s26 }
 0x7c1   : > { %v1665_v41 = vpop.permute.xlu1 %1664  ;;  %v1669_v42 = vpop.permute.xlu0 %1668 }
 0x7c2   : > { %v1675_v43 = vsel %vm622_vm3, %v1659_v39, %v1665_v41 }
 0x7c3   : > { %v1677_v45 = vsel %vm1676_vm4, %v1675_v43, %v1669_v42 }
 0x7c5   : > { %v1673_v44 = vpop.permute.xlu1 %1672 }
 0x7c6   : > { %v1679_v46 = vsel %vm1678_vm5, %v1677_v45, %v1673_v44 }
 0x7c7   : > { %v1680_v48 = vpack.c.bf16 %v1679_v46, %v1679_v46 }
 0x7c9   : > { %3936 = vmatmul.mubr.msk.bf16.vlgmr.msra.gmra.mrb[8].mxu0 %vm376_vm1, %v1680_v48 }
 0x7ca   : > { %3963 = vmatprep.mubr.msk.bf16.mxu0 %vm4267_vm2, %v4266_v18 }
 0x89c   : > { %v1739_v50 = vpop.f32.mrb[8].mxu0 }
 0x89d   : > { %v1740_v51 = vadd.f32 %v3718_v49, %v1739_v50  ;;  %v3937_v52 = vpop.f32.mrb[9].mxu0 }
 0x89e   : > { %v1742_v53 = vpop.f32.mrb[10].mxu0  ;;  %v4126_v52 = vld [vmem:[%s4881_s4 + $0x18] sm:$0xff]  }
 0x89f   : > { %v3938_v54 = vpop.f32.mrb[11].mxu0  ;;  %v1745_v55 = vadd.f32 %v1740_v51, %v4443_v28  ;;  %v4117_v28 = vld [vmem:[%s4884_s7] sm:$0xff]   ;;  %v4125_v51 = vld [vmem:[%s4881_s4 + $0x10] sm:$0xff]  }
 0x8a0   : > { %3948 = vmatpush3.bf16.msra.mxu0 %v4117_v28 }
 0x8a1   : > { %v1746_v56 = vsel %vm376_vm1, %v1745_v55, 0.0  ;;  %3949 = vmatprep.subr.bf16.mxu0 %v4266_v18 }
 0x8a2   : > { %1747 = vadd.xlane.f32.xlu1 %v1746_v56 }
 0x8a4   : > { %3950 = vmatpush3.bf16.msra.mxu0 %v4118_v12 }
 0x8a5   : > { %3951 = vmatprep.subr.bf16.mxu0 %v4266_v18 }
 0x8a8   : > { %3952 = vmatpush3.bf16.msra.mxu0 %v4119_v13 }
 0x8a9   : > { %3953 = vmatprep.subr.bf16.mxu0 %v4266_v18 }
 0x8ac   : > { %3954 = vmatpush3.bf16.msra.mxu0 %v4120_v14 }
 0x8ad   : > { %3955 = vmatprep.subr.bf16.mxu0 %v4266_v18 }
 0x8b0   : > { %3956 = vmatpush3.bf16.msra.mxu0 %v4121_v15 }
 0x8b1   : > { %3957 = vmatprep.subr.bf16.mxu0 %v4266_v18 }
 0x8b4   : > { %3958 = vmatpush3.bf16.msra.mxu0 %v4122_v16 }
 0x8b5   : > { %3959 = vmatprep.subr.bf16.mxu0 %v4266_v18 }
 0x8b8   : > { %3960 = vmatpush3.bf16.msra.mxu0 %v4123_v17 }
 0x8b9   : > { %3961 = vmatprep.subr.bf16.mxu0 %v4266_v18 }
 0x8bc   : > { %3962 = vmatpush3.bf16.msra.mxu0 %v4124_v19 }
 0x8bd   : > { %4005 = vmatprep.subr.mxu0 %v4266_v18 }
 0x92f   : > { %v1748_v57 = vpop.xlane.xlu1 %1747 }
 0x930   : > { %v1749_v58 = vmul.f32 0.03125, %v1748_v57  ;;  %v3737_v57 = vld [vmem:[%s4886_s9 + $0xb] ss:$0 sm:$0xff] }
 0x932   : > { %v1750_v59 = vsub.f32 %v1745_v55, %v1749_v58 }
 0x934   : > { %v1751_v60 = vmul.f32 %v1750_v59, %v1750_v59 }
 0x936   : > { %v1752_v61 = vsel %vm376_vm1, %v1751_v60, 0.0 }
 0x937   : > { %1753 = vadd.xlane.f32.xlu0 %v1752_v61 }
 0x9c4   : > { %v1754_v1 = vpop.xlane.xlu0 %1753 }
 0x9c5   : > { %v1755_v2 = vmul.f32 0.03125, %v1754_v1 }
 0x9c7   : > { %v1756_v3 = vadd.f32 1e-12, %v1755_v2 }
 0x9c9   : > { %4159 = vrsqrt.f32 %v1756_v3 }
 0x9d3   : > { %v4160_v5 = vpop.eup %4159 }
 0x9d4   : > { %v1758_v7 = vmul.f32 %v4160_v5, %v1750_v59  ;;  %v3738_v59 = vld [vmem:[%s4886_s9 + $0xc] ss:$0 sm:$0xff] }
 0x9d6   : > { %v1764_v9 = vmul.f32 %v3722_v6, %v1758_v7 }
 0x9d8   : > { %v1770_v10 = vadd.f32 %v3723_v8, %v1764_v9 }
 0x9da   : > { %v1771_v11 = vpack.c.bf16 %v1770_v10, %v1770_v10 }
 0x9dc   : > { %3944 = vmatmul.mubr.msk.bf16.vlgmr.msra.gmra.mrb[16].mxu1 %vm376_vm1, %v1771_v11 }
 0x9dd   : > { %3971 = vmatprep.mubr.msk.bf16.mxu1 %vm4267_vm2, %v4266_v18  ;;  %3968 = vmatpush3.bf16.msra.mxu1 %v4125_v51 }
 0x9de   : > { %3969 = vmatprep.subr.bf16.mxu1 %v4266_v18 }
 0x9e1   : > { %3970 = vmatpush3.bf16.msra.mxu1 %v4126_v52 }
 0x9e2   : > { %3975 = vmatprep.subr.mxu1 %v4266_v18 }
 0xaaf   : > { %v1830_v21 = vpop.f32.mrb[16].mxu1 }
 0xab0   : > { %v1831_v22 = vadd.f32 %v3724_v20, %v1830_v21  ;;  %v3945_v23 = vpop.f32.mrb[17].mxu1 }
 0xab1   : > { %v1833_v24 = vpop.f32.mrb[18].mxu1 }
 0xab2   : > { %v1837_v25 = vmul.f32 %v1831_v22, %v1831_v22  ;;  %v3946_v26 = vpop.f32.mrb[19].mxu1  ;;  %v1836_v33 = vmul.f32 0.5, %v1831_v22 }
 0xab4   : > { %v1838_v27 = vmul.f32 %v1837_v25, %v1831_v22 }
 0xab6   : > { %v1839_v29 = vmul.f32 0.044715, %v1838_v27 }
 0xab8   : > { %v1840_v30 = vadd.f32 %v1839_v29, %v1831_v22 }
 0xaba   : > { %v1841_v31 = vmul.f32 0.7978846, %v1840_v30 }
 0xabc   : > { %4161 = vtanh.f32 %v1841_v31 }
 0xac6   : > { %v4162_v32 = vpop.eup %4161 }
 0xac7   : > { %v1843_v34 = vadd.f32 1.0, %v4162_v32 }
 0xac9   : > { %v1844_v35 = vmul.f32 %v1843_v34, %v1836_v33 }
 0xacb   : > { %v1845_v36 = vpack.c.bf16 %v1844_v35, %v1844_v35 }
 0xacd   : > { %3964 = vmatmul.mubr.bf16.vlgmr.msra.gmra.mrb[12].mxu0 %v1845_v36 }
 0xace   : > { %4007 = vmatprep.mubr.msk.f32.mxu0 %vm4267_vm2, %v4266_v18 }
 0xba0   : > { %v1949_v38 = vpop.f32.mrb[12].mxu0 }
 0xba1   : > { %v1950_v39 = vadd.f32 %v3728_v37, %v1949_v38  ;;  %v3965_v40 = vpop.f32.mrb[13].mxu0 }
 0xba2   : > { %v1952_v41 = vpop.f32.mrb[14].mxu0 }
 0xba3   : > { %v3966_v42 = vpop.f32.mrb[15].mxu0  ;;  %v1955_v43 = vadd.f32 %v1950_v39, %v1770_v10 }
 0xba5   : > { %v1956_v44 = vsel %vm376_vm1, %v1955_v43, 0.0 }
 0xba6   : > { %1957 = vadd.xlane.f32.xlu1 %v1956_v44 }
 0xc33   : > { %v1958_v45 = vpop.xlane.xlu1 %1957 }
 0xc34   : > { %v1959_v46 = vmul.f32 0.03125, %v1958_v45 }
 0xc36   : > { %v1960_v48 = vsub.f32 %v1955_v43, %v1959_v46 }
 0xc38   : > { %v1961_v49 = vmul.f32 %v1960_v48, %v1960_v48 }
 0xc3a   : > { %v1962_v50 = vsel %vm376_vm1, %v1961_v49, 0.0 }
 0xc3b   : > { %1963 = vadd.xlane.f32.xlu1 %v1962_v50 }
 0xcc8   : > { %v1964_v53 = vpop.xlane.xlu1 %1963 }
 0xcc9   : > { %v1965_v54 = vmul.f32 0.03125, %v1964_v53 }
 0xccb   : > { %v1966_v55 = vadd.f32 1e-12, %v1965_v54 }
 0xccd   : > { %4163 = vrsqrt.f32 %v1966_v55 }
 0xcd7   : > { %v4164_v56 = vpop.eup %4163 }
 0xcd8   : > { %v1968_v58 = vmul.f32 %v4164_v56, %v1960_v48 }
 0xcda   : > { %v1974_v60 = vmul.f32 %v3737_v57, %v1968_v58 }
 0xcdc   : > { %v4643_v61 = vadd.f32 %v3738_v59, %v1974_v60 }
 0xcde   : > { %v1981_v63 = vpack.c.bf16 %v4643_v61, %v4643_v61 }
 0xce0   : > { %3972 = vmatmul.mubr.msk.bf16.vlgmr.msra.gmra.mrb[20].mxu1 %vm376_vm1, %v1981_v63 }
 0xce1   : > { %3977 = vmatprep.mubr.msk.f32.mxu1 %vm4267_vm2, %v4266_v18 }
 0xdb3   : > { %v2041_v28 = vpop.f32.mrb[20].mxu1 }
 0xdb4   : > { %v2042_v1 = vadd.f32 %v3743_v0, %v2041_v28  ;;  %v3973_v2 = vpop.f32.mrb[21].mxu1 }
 0xdb5   : > { %v2044_v3 = vpop.f32.mrb[22].mxu1 }
 0xdb6   : > { %2050 = vrot.lane.b32.xlu1 %v2042_v1, %s4270_s12  ;;  %2048 = vrot.lane.b32.xlu0 %v2042_v1, %s4269_s30  ;;  %v3974_v5 = vpop.f32.mrb[23].mxu1 }
 0xdba   : > { %2052 = vrot.lane.b32.xlu1 %v2042_v1, %s4268_s29  ;;  %2054 = vrot.lane.b32.xlu0 %v2042_v1, %s4271_s14  ;;  %s4205_s29 = scalar_lea.vmem %s4204_s27, 32 }
 0xe28   : > { %v2051_v6 = vpop.permute.xlu1 %2050  ;;  %v2049_v7 = vpop.permute.xlu0 %2048 }
 0xe29   : > { %2058 = vrot.lane.b32.xlu0 %v2051_v6, %s4271_s14  ;;  %2056 = vrot.lane.b32.xlu1 %v2049_v7, %s4271_s14 }
 0xe2c   : > { %v2053_v8 = vpop.permute.xlu1 %2052  ;;  %v2055_v9 = vpop.permute.xlu0 %2054 }
 0xe2d   : > { %2060 = vrot.lane.b32.xlu1 %v2053_v8, %s4271_s14 }
 0xe47   : > { %2066 = vxpose.xlu0.b32.start.end [1/1] (short) (narrow) %v2055_v9, 8 }
 0xe9b   : > { %v2057_v10 = vpop.permute.xlu1 %2056  ;;  %v2059_v11 = vpop.permute.xlu0 %2058 }
 0xe9c   : > { %2098 = vxpose.xlu1.b32.start.end [1/1] (short) (narrow) %v2057_v10, 8  ;;  %2130 = vxpose.xlu0.b32.start.end [1/1] (short) (narrow) %v2059_v11, 8 }
 0xe9f   : > { %v2061_v12 = vpop.permute.xlu1 %2060 }
 0xea0   : > { %2162 = vxpose.xlu0.b32.start.end [1/1] (short) (narrow) %v2061_v12, 8 }
 0xec7   : > { %v2082_v13 = vpop.trf.xlu0 }
 0xec8   : > { %3976 = vmatpush3.msra.mxu1 %v2082_v13 }
 0xec9   : > { %3978 = vmatmul.mubr.msk.f32.vlgmr.msra.gmra.mrb[14].mxu1 %vm622_vm3, %v2042_v1  ;;  %3980 = vmatprep.subr.mxu1 %v4266_v18 }
 0xeca   : > { %3982 = vmatprep.mubr.msk.f32.mxu1 %vm4267_vm2, %v4266_v18 }
 0xf1c   : > { %v2114_v14 = vpop.trf.xlu1  ;;  %v2146_v15 = vpop.trf.xlu0 }
 0xf1d   : > { %3981 = vmatpush3.msra.mxu1 %v2114_v14 }
 0xf1e   : > { %3983 = vmatmul.mubr.msk.f32.vlgmr.msra.gmra.mrb[24].mxu1 %vm622_vm3, %v2049_v7  ;;  %3985 = vmatprep.subr.mxu1 %v4266_v18 }
 0xf1f   : > { %3986 = vmatpush3.msra.mxu1 %v2146_v15  ;;  %3987 = vmatprep.mubr.msk.f32.mxu1 %vm4267_vm2, %v4266_v18 }
 0xf20   : > { %3990 = vmatprep.subr.mxu1 %v4266_v18  ;;  %v2178_v16 = vpop.trf.xlu0 }
 0xf22   : > { %3988 = vmatmul.mubr.msk.f32.vlgmr.msra.gmra.mrb[26].mxu1 %vm622_vm3, %v2051_v6 }
 0xf23   : > { %3991 = vmatpush3.msra.mxu1 %v2178_v16  ;;  %3992 = vmatprep.mubr.msk.f32.mxu1 %vm4267_vm2, %v4266_v18 }
 0xf24   : > { %3995 = vmatprep.subr.mxu1 %v4266_v18 }
 0xf26   : > { %3993 = vmatmul.mubr.msk.f32.vlgmr.msra.gmra.mrb[28].mxu1 %vm622_vm3, %v2053_v8 }
 0xf27   : > { %3997 = vmatprep.mubr.msk.f32.mxu1 %vm4267_vm2, %v4266_v18 }
 0xf9c   : > { %v2262_v17 = vpop.f32.mrb[14].mxu1 }
 0xf9d   : > { %v2263_v19 = vadd.f32 %v4488_v47, %v2262_v17  ;;  %v3979_v20 = vpop.f32.mrb[15].mxu1 }
 0xf9f   : > { %v2482_v21 = vsel %vm622_vm3, %v2263_v19, -inf }
 0xfa0   : > { %2483 = vmax.xlane.f32.xlu0 %v2482_v21 }
 0xff1   : > { %v2334_v22 = vpop.f32.mrb[24].mxu1 }
 0xff2   : > { %v2335_v23 = vadd.f32 %v4488_v47, %v2334_v22  ;;  %v3984_v24 = vpop.f32.mrb[25].mxu1 }
 0xff4   : > { %v2485_v25 = vsel %vm622_vm3, %v2335_v23, -inf }
 0xff5   : > { %2486 = vmax.xlane.f32.xlu1 %v2485_v25  ;;  %v2406_v26 = vpop.f32.mrb[26].mxu1 }
 0xff6   : > { %v2407_v27 = vadd.f32 %v4488_v47, %v2406_v26  ;;  %v3989_v29 = vpop.f32.mrb[27].mxu1 }
 0xff8   : > { %v2488_v30 = vsel %vm622_vm3, %v2407_v27, -inf }
 0xff9   : > { %2489 = vmax.xlane.f32.xlu1 %v2488_v30  ;;  %v2478_v31 = vpop.f32.mrb[28].mxu1 }
 0xffa   : > { %v2479_v32 = vadd.f32 %v4488_v47, %v2478_v31  ;;  %v3994_v33 = vpop.f32.mrb[29].mxu1 }
 0xffc   : > { %v2491_v34 = vsel %vm622_vm3, %v2479_v32, -inf }
 0xffd   : > { %2492 = vmax.xlane.f32.xlu0 %v2491_v34 }
0x100a   : > { %2526 = vrot.lane.b32.xlu1 %v2042_v1, %s4272_s25 }
0x1013   : > { %2528 = vrot.lane.b32.xlu0 %v2049_v7, %s4272_s25 }
0x1017   : > { %2530 = vrot.lane.b32.xlu0 %v2051_v6, %s4272_s25 }
0x101b   : > { %2532 = vrot.lane.b32.xlu0 %v2053_v8, %s4272_s25 }
0x102d   : > { %v2484_v35 = vpop.xlane.xlu0 %2483 }
0x102e   : > { %v2494_v36 = vsub.f32 %v2263_v19, %v2484_v35 }
0x1030   : > { %v2498_v37 = vmul.f32 1.442695, %v2494_v36 }
0x1032   : > { %4165 = vpow2.f32 %v2498_v37 }
0x103c   : > { %v4166_v38 = vpop.eup %4165 }
0x103d   : > { %v2506_v39 = vsel %vm622_vm3, %v4166_v38, 0.0 }
0x103e   : > { %2507 = vadd.xlane.f32.xlu1 %v2506_v39  ;;  %v4127_v39 = vld [vmem:[%s4882_s5 + $0x10] sm:$0xff]  }
0x1082   : > { %v2487_v47 = vpop.xlane.xlu1 %2486 }
0x1083   : > { %v2495_v40 = vsub.f32 %v2335_v23, %v2487_v47 }
0x1085   : > { %v2500_v41 = vmul.f32 1.442695, %v2495_v40 }
0x1086   : > { %v2490_v42 = vpop.xlane.xlu1 %2489 }
0x1087   : > { %4167 = vpow2.f32 %v2500_v41  ;;  %v2496_v43 = vsub.f32 %v2407_v27, %v2490_v42 }
0x1089   : > { %v2502_v44 = vmul.f32 1.442695, %v2496_v43 }
0x108a   : > { %v2493_v45 = vpop.xlane.xlu0 %2492  ;;  %v2527_v57 = vpop.permute.xlu1 %2526 }
0x108b   : > { %4169 = vpow2.f32 %v2502_v44  ;;  %v2497_v46 = vsub.f32 %v2479_v32, %v2493_v45 }
0x108d   : > { %v2504_v48 = vmul.f32 1.442695, %v2497_v46 }
0x108e   : > { %v2529_v55 = vpop.permute.xlu0 %2528 }
0x108f   : > { %4171 = vpow2.f32 %v2504_v48  ;;  %v4128_v48 = vld [vmem:[%s4882_s5 + $0x18] sm:$0xff]  }
0x1091   : > { %v4168_v49 = vpop.eup %4167 }
0x1092   : > { %v2509_v50 = vsel %vm622_vm3, %v4168_v49, 0.0  ;;  %v2531_v56 = vpop.permute.xlu0 %2530 }
0x1093   : > { %2510 = vadd.xlane.f32.xlu0 %v2509_v50 }
0x1095   : > { %v4170_v51 = vpop.eup %4169 }
0x1096   : > { %v2512_v52 = vsel %vm622_vm3, %v4170_v51, 0.0  ;;  %v2533_v58 = vpop.permute.xlu0 %2532 }
0x1097   : > { %2513 = vadd.xlane.f32.xlu1 %v2512_v52 }
0x1099   : > { %v4172_v53 = vpop.eup %4171 }
0x109a   : > { %v2515_v54 = vsel %vm622_vm3, %v4172_v53, 0.0 }
0x109b   : > { %2516 = vadd.xlane.f32.xlu1 %v2515_v54 }
0x10c0   : > { %2570 = vxpose.xlu0.b32.start.end [1/1] (short) (narrow) %v2529_v55, 8 }
0x10c4   : > { %2602 = vxpose.xlu0.b32.start.end [1/1] (short) (narrow) %v2531_v56, 8 }
0x10c8   : > { %2634 = vxpose.xlu0.b32.start.end [1/1] (short) (narrow) %v2533_v58, 8 }
0x10cb   : > { %v2508_v59 = vpop.xlane.xlu1 %2507 }
0x10cc   : > { %4173 = vrcp.f32 %v2508_v59 }
0x10ce   : > { %2538 = vxpose.xlu1.b32.start.end [1/1] (short) (narrow) %v2527_v57, 8 }
0x10d6   : > { %v4174_v60 = vpop.eup %4173 }
0x10d7   : > { %v2522_v63 = vmul.f32 %v4174_v60, %v4166_v38 }
0x10d9   : > { %3996 = vmatpush3.xpose.msk.msra.mxu1 %vm622_vm3, %v2522_v63 }
0x10da   : > { %4000 = vmatprep.subr.mxu1 %v4266_v18 }
0x1120   : > { %v2511_v2 = vpop.xlane.xlu0 %2510 }
0x1124   : > { %v2514_v0 = vpop.xlane.xlu1 %2513 }
0x1125   : > { %4175 = vrcp.f32 %v2514_v0 }
0x1126   : > { %4177 = vrcp.f32 %v2511_v2 }
0x1128   : > { %v2517_v5 = vpop.xlane.xlu1 %2516 }
0x1129   : > { %4179 = vrcp.f32 %v2517_v5 }
0x112f   : > { %v4176_v28 = vpop.eup %4175 }
0x1130   : > { %v2524_v1 = vmul.f32 %v4176_v28, %v4170_v51  ;;  %v4178_v7 = vpop.eup %4177 }
0x1131   : > { %v2523_v8 = vmul.f32 %v4178_v7, %v4168_v49 }
0x1132   : > { %4006 = vmatpush3.xpose.msk.msra.mxu0 %vm622_vm3, %v2524_v1 }
0x1133   : > { %4015 = vmatprep.subr.bf16.mxu0 %v4266_v18  ;;  %v4180_v10 = vpop.eup %4179 }
0x1134   : > { %v2525_v11 = vmul.f32 %v4180_v10, %v4172_v53 }
0x1140   : > { %v2586_v3 = vpop.trf.xlu0 }
0x1144   : > { %v2618_v6 = vpop.trf.xlu0 }
0x1145   : > { %4008 = vmatmul.mubr.msk.f32.vlgmr.msra.gmra.mrb[6].mxu0 %vm622_vm3, %v2618_v6 }
0x1146   : > { %4019 = vmatprep.mubr.msk.bf16.mxu0 %vm4267_vm2, %v4266_v18  ;;  %4016 = vmatpush3.bf16.msra.mxu0 %v4127_v39  ;;  %v4136_v39 = vld [vmem:[%s4884_s7 + $0x68] sm:$0xff]  }
0x1147   : > { %4017 = vmatprep.subr.bf16.mxu0 %v4266_v18 }
0x1148   : > { %v2650_v12 = vpop.trf.xlu0 }
0x114a   : > { %4018 = vmatpush3.bf16.msra.mxu0 %v4128_v48 }
0x114b   : > { %4031 = vmatprep.subr.bf16.mxu0 %v4266_v18 }
0x114e   : > { %v2554_v9 = vpop.trf.xlu1 }
0x114f   : > { %3998 = vmatmul.mubr.msk.f32.vlgmr.msra.gmra.mrb[30].mxu1 %vm622_vm3, %v2554_v9 }
0x1150   : > { %4001 = vmatpush3.xpose.msk.msra.mxu1 %vm622_vm3, %v2523_v8  ;;  %4002 = vmatprep.mubr.msk.f32.mxu1 %vm4267_vm2, %v4266_v18  ;;  %v3765_v8 = vld [vmem:[%s4886_s9 + $0xe] ss:$0 sm:$0xff] }
0x1151   : > { %4010 = vmatprep.subr.mxu1 %v4266_v18 }
0x1153   : > { %4003 = vmatmul.mubr.msk.f32.vlgmr.msra.gmra.mrb[32].mxu1 %vm622_vm3, %v2586_v3 }
0x1154   : > { %4011 = vmatpush3.xpose.msk.msra.mxu1 %vm622_vm3, %v2525_v11  ;;  %4012 = vmatprep.mubr.msk.f32.mxu1 %vm4267_vm2, %v4266_v18 }
0x1155   : > { %4023 = vmatprep.subr.bf16.mxu1 %v4266_v18 }
0x1157   : > { %4013 = vmatmul.mubr.msk.f32.vlgmr.msra.gmra.mrb[34].mxu1 %vm622_vm3, %v2650_v12 }
0x1158   : > { %4027 = vmatprep.mubr.msk.bf16.mxu1 %vm4267_vm2, %v4266_v18 }
0x1218   : > { %v2890_v13 = vpop.f32.mrb[6].mxu0 }
0x1219   : > { %v4009_v14 = vpop.f32.mrb[7].mxu0 }
0x1222   : > { %v2738_v15 = vpop.f32.mrb[30].mxu1 }
0x1223   : > { %v3999_v16 = vpop.f32.mrb[31].mxu1  ;;  %2970 = vxpose.xlu1.b32.start.end [1/1] (short) (narrow) %v2738_v15, 8 }
0x1226   : > { %v2814_v17 = vpop.f32.mrb[32].mxu1 }
0x1227   : > { %3002 = vxpose.xlu0.b32.start.end [1/1] (short) (narrow) %v2814_v17, 8  ;;  %v4004_v19 = vpop.f32.mrb[33].mxu1  ;;  %3034 = vxpose.xlu1.b32.start.end [1/1] (short) (narrow) %v2890_v13, 8 }
0x122a   : > { %v2966_v20 = vpop.f32.mrb[34].mxu1 }
0x122b   : > { %3066 = vxpose.xlu0.b32.start.end [1/1] (short) (narrow) %v2966_v20, 8  ;;  %v4014_v21 = vpop.f32.mrb[35].mxu1 }
0x12a3   : > { %v2986_v22 = vpop.trf.xlu1 }
0x12a7   : > { %v3018_v23 = vpop.trf.xlu0  ;;  %v3050_v24 = vpop.trf.xlu1 }
0x12a8   : > { %v3098_v25 = vcombine.low %v2986_v22, %v3050_v24  ;;  %v3099_v26 = vcombine.high %v2986_v22, %v3050_v24  ;;  %v4129_v22 = vld [vmem:[%s4883_s6 + $0x10] sm:$0xff]  }
0x12a9   : > { %4024 = vmatpush3.bf16.msra.mxu1 %v4129_v22 }
0x12aa   : > { %v3106_v33 = vrot.slane %v3098_v25, %v4527_v62  ;;  %v3113_v34 = vrot.slane %v3099_v26, %v4527_v62  ;;  %4025 = vmatprep.subr.bf16.mxu1 %v4266_v18 }
0x12ab   : > { %v3082_v27 = vpop.trf.xlu0 }
0x12ac   : > { %v3114_v29 = vcombine.low %v3018_v23, %v3082_v27  ;;  %v3115_v30 = vcombine.high %v3018_v23, %v3082_v27  ;;  %v4130_v23 = vld [vmem:[%s4883_s6 + $0x18] sm:$0xff]  }
0x12ad   : > { %4026 = vmatpush3.bf16.msra.mxu1 %v4130_v23  ;;  %v3562_v23 = vld [vmem:[%s4886_s9 + $0x4] sm:$0x1] }
0x12ae   : > { %v3122_v31 = vrot.slane %v3114_v29, %v4527_v62  ;;  %v3129_v32 = vrot.slane %v3115_v30, %v4527_v62  ;;  %4051 = vmatprep.subr.bf16.mxu1 %v4266_v18  ;;  %v3769_v29 = vld [vmem:[%s4886_s9 + $0xf] ss:$0 sm:$0xff] }
0x12b0   : > { %v3130_v35 = vcombine.low %v3106_v33, %v3122_v31  ;;  %v3131_v36 = vcombine.high %v3106_v33, %v3122_v31  ;;  %v3146_v37 = vcombine.low %v3113_v34, %v3129_v32  ;;  %v3147_v38 = vcombine.high %v3113_v34, %v3129_v32  ;;  %v3770_v31 = vld [vmem:[%s4886_s9 + $0x10] ss:$0 sm:$0xff] }
0x12b2   : > { %v3138_v47 = vrot.slane %v3130_v35, %v4529_v4  ;;  %v3145_v40 = vrot.slane %v3131_v36, %v4529_v4  ;;  %v3154_v41 = vrot.slane %v3146_v37, %v4529_v4  ;;  %v3161_v42 = vrot.slane %v3147_v38, %v4529_v4  ;;  %v4132_v35 = vld [vmem:[%s4884_s7 + $0x48] sm:$0xff]   ;;  %v4133_v36 = vld [vmem:[%s4884_s7 + $0x50] sm:$0xff]   ;;  %v4134_v37 = vld [vmem:[%s4884_s7 + $0x58] sm:$0xff]  }
0x12b3   : > { %v4135_v38 = vld [vmem:[%s4884_s7 + $0x60] sm:$0xff]  }
0x12b4   : > { %v3166_v43 = vcombine.low %v3138_v47, %v3145_v40  ;;  %v3759_v44 = vcombine.high %v3138_v47, %v3145_v40  ;;  %v3182_v45 = vcombine.low %v3154_v41, %v3161_v42  ;;  %v3760_v46 = vcombine.high %v3154_v41, %v3161_v42  ;;  %v4137_v47 = vld [vmem:[%s4884_s7 + $0x70] sm:$0xff]   ;;  %v4138_v40 = vld [vmem:[%s4884_s7 + $0x78] sm:$0xff]  }
0x12b5   : > { %v3775_v41 = vld [vmem:[%s4886_s9 + $0x11] ss:$0 sm:$0xff] }
0x12b6   : > { %v3173_v49 = vrot.slane %v3166_v43, %v4527_v62  ;;  %v3181_v50 = vrot.slane %v3759_v44, %v4527_v62  ;;  %v3189_v51 = vrot.slane %v3182_v45, %v4527_v62  ;;  %v3197_v52 = vrot.slane %v3760_v46, %v4527_v62 }
0x12b8   : > { %v3198_v53 = vcombine.low %v3173_v49, %v3181_v50  ;;  %v3214_v54 = vcombine.low %v3189_v51, %v3197_v52  ;;  %v3199_v55 = vcombine.high %v3173_v49, %v3181_v50  ;;  %v3215_v56 = vcombine.high %v3189_v51, %v3197_v52 }
0x12ba   : > { %v3206_v57 = vrot.slane %v3198_v53, %v4529_v4  ;;  %v3222_v58 = vrot.slane %v3214_v54, %v4529_v4  ;;  %v3213_v59 = vrot.slane %v3199_v55, %v4529_v4  ;;  %v3229_v60 = vrot.slane %v3215_v56, %v4529_v4 }
0x12bc   : > { %v3231_v63 = vcombine.high %v3206_v57, %v3222_v58  ;;  %v3232_v0 = vcombine.low %v3213_v59, %v3229_v60  ;;  %v3230_v28 = vcombine.low %v3206_v57, %v3222_v58  ;;  %v3233_v62 = vcombine.high %v3213_v59, %v3229_v60  ;;  %v3795_v58 = vld [vmem:[%s4886_s9 + $0x12] ss:$0 sm:$0xff] }
0x12be   : > { %3235 = vrot.lane.b32.xlu1 %v3231_v63, %s4276_s23  ;;  %3239 = vrot.lane.b32.xlu0 %v3232_v0, %s4275_s0  ;;  %s326_s23 = sand.u32 1, %s4255_s19  }
0x12bf   : > { %s327_s13 = scalar_lea.vmem [#allocation5], %s326_s23  ;;  %s3620_s20 = scalar_lea.sflag [#allocation6], %s326_s23 }
0x12c0   : > { %s3632_s15 = sshll.u32 %s327_s13, 4  ;;  %s4837_s15 = int_to_ptr.vmem [resolvable:$true] %s3632_s15 }
0x12c1   : > { %s4199_s21 = scalar_lea.vmem %s4837_s15, 16  ;;  %p4206_p5 = scmp.lt.s32.totalorder %s4837_s15, %s4204_s27 }
0x12c2   : > { %3243 = vrot.lane.b32.xlu1 %v3233_v62, %s4277_s26  ;;  %p4200_p2 = scmp.ne.s32.totalorder %s4837_s15, %s4199_s21  ;;  %p4207_p6 = scmp.lt.s32.totalorder %s4205_s29, %s4199_s21 }
0x12c4   : > { %p4201_p3 = pnand %p4200_p2, %p4375_p10  ;;  %p4208_p7 = por %p4207_p6, %p4206_p5 }
0x12c6   : > { %p4202_p4 = pneg %p4201_p3 }
0x12c8   : > { %p4209_p8 = pnand %p4208_p7, %p4202_p4 }
0x1330   : > { %v3236_v1 = vpop.permute.xlu1 %3235  ;;  %v3240_v3 = vpop.permute.xlu0 %3239 }
0x1331   : > { %v3246_v2 = vsel %vm622_vm3, %v3230_v28, %v3236_v1 }
0x1332   : > { %v3247_v5 = vsel %vm1676_vm4, %v3246_v2, %v3240_v3 }
0x1334   : > { %v3244_v6 = vpop.permute.xlu1 %3243 }
0x1335   : > { %v3248_v7 = vsel %vm1678_vm5, %v3247_v5, %v3244_v6 }
0x1336   : > { %v3249_v4 = vpack.c.bf16 %v3248_v7, %v3248_v7 }
0x1338   : > { %4020 = vmatmul.mubr.msk.bf16.vlgmr.msra.gmra.mrb[16].mxu0 %vm376_vm1, %v3249_v4  ;;  %v4139_v4 = vld [vmem:[%s4885_s8] sm:$0xff]  }
0x1339   : > { %4047 = vmatprep.mubr.msk.bf16.mxu0 %vm4267_vm2, %v4266_v18 }
0x140b   : > { %v3309_v9 = vpop.f32.mrb[16].mxu0 }
0x140c   : > { %v3310_v10 = vadd.f32 %v3765_v8, %v3309_v9  ;;  %v4021_v11 = vpop.f32.mrb[17].mxu0  ;;  %v4140_v8 = vld [vmem:[%s4885_s8 + $0x8] sm:$0xff]  }
0x140d   : > { %v3312_v12 = vpop.f32.mrb[18].mxu0 }
0x140e   : > { %v4022_v13 = vpop.f32.mrb[19].mxu0  ;;  %v3315_v14 = vadd.f32 %v3310_v10, %v4643_v61  ;;  %v4131_v61 = vld [vmem:[%s4884_s7 + $0x40] sm:$0xff]  }
0x140f   : > { %4032 = vmatpush3.bf16.msra.mxu0 %v4131_v61  ;;  %v3804_v13 = vld [vmem:[%s4886_s9 + $0x13] ss:$0 sm:$0xff] }
0x1410   : > { %v3316_v15 = vsel %vm376_vm1, %v3315_v14, 0.0  ;;  %4033 = vmatprep.subr.bf16.mxu0 %v4266_v18 }
0x1411   : > { %3317 = vadd.xlane.f32.xlu1 %v3316_v15  ;;  %v3805_v15 = vld [vmem:[%s4886_s9 + $0x14] ss:$0 sm:$0xff] }
0x1413   : > { %4034 = vmatpush3.bf16.msra.mxu0 %v4132_v35 }
0x1414   : > { %4035 = vmatprep.subr.bf16.mxu0 %v4266_v18 }
0x1417   : > { %4036 = vmatpush3.bf16.msra.mxu0 %v4133_v36 }
0x1418   : > { %4037 = vmatprep.subr.bf16.mxu0 %v4266_v18 }
0x141b   : > { %4038 = vmatpush3.bf16.msra.mxu0 %v4134_v37 }
0x141c   : > { %4039 = vmatprep.subr.bf16.mxu0 %v4266_v18 }
0x141f   : > { %4040 = vmatpush3.bf16.msra.mxu0 %v4135_v38 }
0x1420   : > { %4041 = vmatprep.subr.bf16.mxu0 %v4266_v18 }
0x1423   : > { %4042 = vmatpush3.bf16.msra.mxu0 %v4136_v39 }
0x1424   : > { %4043 = vmatprep.subr.bf16.mxu0 %v4266_v18 }
0x1427   : > { %4044 = vmatpush3.bf16.msra.mxu0 %v4137_v47 }
0x1428   : > { %4045 = vmatprep.subr.bf16.mxu0 %v4266_v18 }
0x142b   : > { %4046 = vmatpush3.bf16.msra.mxu0 %v4138_v40 }
0x149e   : > { %v3318_v16 = vpop.xlane.xlu1 %3317 }
0x149f   : > { %v3319_v17 = vmul.f32 0.03125, %v3318_v16 }
0x14a1   : > { %v3320_v19 = vsub.f32 %v3315_v14, %v3319_v17 }
0x14a3   : > { %v3321_v20 = vmul.f32 %v3320_v19, %v3320_v19 }
0x14a5   : > { %v3322_v21 = vsel %vm376_vm1, %v3321_v20, 0.0 }
0x14a6   : > { %3323 = vadd.xlane.f32.xlu0 %v3322_v21 }
0x1533   : > { %v3324_v24 = vpop.xlane.xlu0 %3323 }
0x1534   : > { %v3325_v25 = vmul.f32 0.03125, %v3324_v24 }
0x1536   : > { %v3326_v26 = vadd.f32 1e-12, %v3325_v25 }
0x1538   : > { %4181 = vrsqrt.f32 %v3326_v26 }
0x1542   : > { %v4182_v27 = vpop.eup %4181 }
0x1543   : > { %v3328_v30 = vmul.f32 %v4182_v27, %v3320_v19  ;;  %v3555_v19 = vld [vmem:[%s4886_s9 + $0x3] sm:$0x1] }
0x1545   : > { %v3334_v32 = vmul.f32 %v3769_v29, %v3328_v30 }
0x1547   : > { %v3340_v33 = vadd.f32 %v3770_v31, %v3334_v32 }
0x1549   : > { %v3341_v34 = vpack.c.bf16 %v3340_v33, %v3340_v33 }
0x154b   : > { %4028 = vmatmul.mubr.msk.bf16.vlgmr.msra.gmra.mrb[36].mxu1 %vm376_vm1, %v3341_v34 }
0x154c   : > { %4055 = vmatprep.mubr.msk.bf16.mxu1 %vm4267_vm2, %v4266_v18  ;;  %4052 = vmatpush3.bf16.msra.mxu1 %v4139_v4 }
0x154d   : > { %4053 = vmatprep.subr.bf16.mxu1 %v4266_v18  ;;  %v3553_v18 = vld [vmem:[%s4886_s9 + $0x2] sm:$0x1] }
0x1550   : > { %4054 = vmatpush3.bf16.msra.mxu1 %v4140_v8 }
0x161e   : > { %v3401_v42 = vpop.f32.mrb[36].mxu1 }
0x161f   : > { %v3402_v43 = vadd.f32 %v3775_v41, %v3401_v42  ;;  %v4029_v44 = vpop.f32.mrb[37].mxu1 }
0x1620   : > { %v3404_v45 = vpop.f32.mrb[38].mxu1 }
0x1621   : > { %v3408_v46 = vmul.f32 %v3402_v43, %v3402_v43  ;;  %v4030_v48 = vpop.f32.mrb[39].mxu1  ;;  %v3407_v54 = vmul.f32 0.5, %v3402_v43 }
0x1623   : > { %v3409_v49 = vmul.f32 %v3408_v46, %v3402_v43 }
0x1625   : > { %v3410_v50 = vmul.f32 0.044715, %v3409_v49 }
0x1627   : > { %v3411_v51 = vadd.f32 %v3410_v50, %v3402_v43 }
0x1629   : > { %v3412_v52 = vmul.f32 0.7978846, %v3411_v51 }
0x162b   : > { %4183 = vtanh.f32 %v3412_v52 }
0x1635   : > { %v4184_v53 = vpop.eup %4183 }
0x1636   : > { %v3414_v55 = vadd.f32 1.0, %v4184_v53 }
0x1638   : > { %v3415_v56 = vmul.f32 %v3414_v55, %v3407_v54 }
0x163a   : > { %v3416_v57 = vpack.c.bf16 %v3415_v56, %v3415_v56 }
0x163c   : > { %4048 = vmatmul.mubr.bf16.vlgmr.msra.gmra.mrb[20].mxu0 %v3416_v57 }
0x170f   : > { %v3521_v59 = vpop.f32.mrb[20].mxu0 }
0x1710   : > { %v3522_v60 = vadd.f32 %v3795_v58, %v3521_v59  ;;  %v4049_v63 = vpop.f32.mrb[21].mxu0 }
0x1711   : > { %v3524_v0 = vpop.f32.mrb[22].mxu0 }
0x1712   : > { %v4050_v28 = vpop.f32.mrb[23].mxu0  ;;  %v3527_v62 = vadd.f32 %v3522_v60, %v3340_v33 }
0x1714   : > { %v3528_v1 = vsel %vm376_vm1, %v3527_v62, 0.0 }
0x1715   : > { %3529 = vadd.xlane.f32.xlu1 %v3528_v1 }
0x17a2   : > { %v3530_v2 = vpop.xlane.xlu1 %3529 }
0x17a3   : > { %v3531_v3 = vmul.f32 0.03125, %v3530_v2 }
0x17a5   : > { %v3532_v5 = vsub.f32 %v3527_v62, %v3531_v3 }
0x17a7   : > { %v3533_v6 = vmul.f32 %v3532_v5, %v3532_v5 }
0x17a9   : > { %v3534_v7 = vsel %vm376_vm1, %v3533_v6, 0.0 }
0x17aa   : > { %3535 = vadd.xlane.f32.xlu1 %v3534_v7 }
0x1837   : > { %v3536_v9 = vpop.xlane.xlu1 %3535 }
0x1838   : > { %v3537_v10 = vmul.f32 0.03125, %v3536_v9 }
0x183a   : > { %v3538_v11 = vadd.f32 1e-12, %v3537_v10 }
0x183c   : > { %4185 = vrsqrt.f32 %v3538_v11 }
0x1846   : > { %v4186_v12 = vpop.eup %4185 }
0x1847   : > { %v3540_v14 = vmul.f32 %v4186_v12, %v3532_v5 }
0x1849   : > { %v3546_v16 = vmul.f32 %v3804_v13, %v3540_v14 }
0x184b   : > { %v3552_v17 = vadd.f32 %v3805_v15, %v3546_v16 }
0x184d   : > { %v3554_v20 = vmul.f32 %v3553_v18, %v3552_v17 }
0x184f   : > { %v3556_v21 = vadd.f32 %v3555_v19, %v3554_v20 }
0x1851   : > { %v3557_v22 = vpack.c.bf16 %v3556_v21, %v3556_v21 }
0x1853   : > { %4056 = vmatmul.mubr.msk.bf16.vlgmr.msra.gmra.mrb[40].mxu1 %vm376_vm1, %v3557_v22 }
0x1926   : > { %v3612_v61 = vpop.f32.mrb[40].mxu1 }
0x1927   : > { %v3613_v24 = vadd.f32 %v3612_v61, %v3562_v23  ;;  %v4057_v25 = vpop.f32.mrb[41].mxu1 }
0x1928   : > { %v3615_v26 = vpop.f32.mrb[42].mxu1 }
0x1929   : > { %3618 = vst [vmem:[%s327_s13] sm:$0x1] %v3613_v24  ;;  %v4058_v27 = vpop.f32.mrb[43].mxu1 }
0x192a   : > { %4212 = shalt.err (!%p4209_p8)
}
0x192b   : > { %s4213_s30 = scalar_lea.hbm %s4835_s10, 16  ;;  %s4217_s25 = scalar_lea.hbm %s4908_s24, 32 }
0x192c   : > { %p4214_p9 = scmp.ne.s32.totalorder %s4835_s10, %s4213_s30  ;;  %p4218_p0 = scmp.lt.u32.totalorder %s4835_s10, %s4908_s24 }
0x192d   : > { %p4219_p1 = scmp.lt.u32.totalorder %s4217_s25, %s4213_s30  ;;  %p4221_p3 = scmp.lt.u32.totalorder %s4213_s30, %s4835_s10 }
0x192e   : > { %p4215_p12 = pnand %p4214_p9, %p4375_p10 }
0x192f   : > { %p4220_p2 = por %p4219_p1, %p4218_p0 }
0x1930   : > { %p4216_p13 = pneg %p4215_p12 }
0x1931   : > { %p4222_p4 = por %p4221_p3, %p4220_p2 }
0x1933   : > { %p4223_p5 = pnand %p4222_p4, %p4216_p13 }
0x1935   : > { %4226 = shalt.err (!%p4223_p5)
}
0x1936   : > { %4059 = dma.vmem_to_hbm [thread:$0]  (%p4375_p10), %s4837_s15, 16, %s4835_s10, %s3620_s20  }
0x1937 PF: > { %s4909_s26 = sld [smem:[#allocation11_spill]]  ;;  %s4910_s16 = sld [smem:[#allocation9_spill]] }
0x193d   : > { %p4065_p6 = scmp.ge.s32.totalorder %s4909_s26, 2  ;;  %s3644_s13 = sand.u32 1, %s4910_s16  }
0x193e   : > { %s3645_s18 = scalar_lea.sflag [#allocation6], %s3644_s13 }
0x193f   : > { %p4062_p7 = pnand %p4065_p6, %p4379_p11 }
0x1941   : > { %4246 = dma.done.wait (!%p4062_p7), %s3645_s18, 16  }
0x1942   : > { %4248 = vsyncadd (!%p4062_p7), %s3645_s18, 4294967280  ;;  %s4912_s20 = sld [smem:[#allocation12_spill]]  ;;  %s4913_s17 = sld [smem:[#allocation10_spill]] }
0x1943   : > { %s4914_s0 = sld [smem:[#allocation13_spill]]  ;;  %s4915_s18 = smov %s4255_s19 }
0x1948   : > { %p26_p8 = scmp.ge.s32.totalorder %s4912_s20, 4   ;;  %s4916_s19 = smov %s4913_s17 }
0x194a   :  { %28 = sbr.rel (!%p26_p8) target bundleno = 18 (0x12), region = 103 }
0x1951   :  { %3649 = vsyncpa [#allocation6], 1 }
0x1952   :  { %3651 = vsyncpa [#allocation6 + $0x1], 1 }

</bundles_post_ra>
